<compile_context>
chip_gen: v5e
topology: v5e:2x2
jax: 0.10.0
libtpu: 0.0.40
codegen_flags: <defaults>
</compile_context>

<pallas_src>
import jax
import jax.numpy as jnp
from jax.experimental import pallas as pl

# ---------------- configuration (small synthetic shapes) ----------------
B, S, D = 2, 8, 32          # batch, seq_len, transformer hidden_size
H = 32                      # rnn hidden_dim
FFN = 64                    # transformer feed-forward dim
VOCAB = 100
CLASS_NUM = 5
FC_IN = 2 * H + D           # 96
OUT_LANES = 128             # lane-dense packed output width (one full vreg lane span)


# ---------------- fused Pallas kernel ----------------
def fused_kernel(x_ref, mask_ref,
                 ln0g_ref, ln0b_ref, wqkv_ref, bqkv_ref, wo_ref, bo_ref,
                 ln1g_ref, ln1b_ref, w1_ref, b1_ref, w2_ref, b2_ref,
                 ln2g_ref, ln2b_ref, wp_ref, bp_ref,
                 wih_ref, whhf_ref, whhb_ref, bf_ref, bb_ref,
                 wfc_ref, bfc_ref,
                 out_ref):
    """Whole network in one kernel.  Activations are time-major flattened:
    row index = s*B + b, shape (S*B, D)."""
    x = x_ref[...]                    # (S*B, D)
    mask = mask_ref[...]              # (S*B, S*B) block-diagonal attention mask

    def layernorm(v, g, b):
        mu = jnp.mean(v, axis=-1, keepdims=True)
        var = jnp.mean((v - mu) ** 2, axis=-1, keepdims=True)
        return (v - mu) * jax.lax.rsqrt(var + 1e-12) * g + b

    # --- transformer encoder layer (single head), whole batch folded into one matmul ---
    x = layernorm(x, ln0g_ref[...], ln0b_ref[...])
    qkv = jnp.dot(x, wqkv_ref[...], preferred_element_type=jnp.float32) + bqkv_ref[...]
    q, k, v = qkv[:, :D], qkv[:, D:2 * D], qkv[:, 2 * D:]
    scores = jnp.dot(q, k.T, preferred_element_type=jnp.float32) * (1.0 / (float(D) ** 0.5))
    scores = scores + (1.0 - mask) * (-1e9)        # cross-batch & padded keys masked
    attn = jax.nn.softmax(scores, axis=-1)
    ctx = jnp.dot(attn, v, preferred_element_type=jnp.float32)
    ctx = jnp.dot(ctx, wo_ref[...], preferred_element_type=jnp.float32) + bo_ref[...]
    x = layernorm(x + ctx, ln1g_ref[...], ln1b_ref[...])
    h1 = jnp.dot(x, w1_ref[...], preferred_element_type=jnp.float32) + b1_ref[...]
    h1 = jnp.maximum(h1, 0.0)
    h2 = jnp.dot(h1, w2_ref[...], preferred_element_type=jnp.float32) + b2_ref[...]
    x = layernorm(x + h2, ln2g_ref[...], ln2b_ref[...])

    # pooler on CLS rows (time-major: rows 0..B-1 are s == 0)
    cls = jnp.tanh(jnp.dot(x[:B, :], wp_ref[...],
                           preferred_element_type=jnp.float32) + bp_ref[...])     # (B, D)

    # --- bidirectional LSTM ---
    # Input projection hoisted out of the recurrence: one (S*B, D) @ (D, 8H) matmul.
    gates_x = jnp.dot(x, wih_ref[...], preferred_element_type=jnp.float32)        # (S*B, 8H)
    whh_f = whhf_ref[...]
    whh_b = whhb_ref[...]
    b_f = bf_ref[...]
    b_b = bb_ref[...]

    def cell(gates, c_prev):
        # full (B, 4H)=128-lane vreg nonlinearities on the EUP, then extract gates once
        sg = jax.nn.sigmoid(gates)
        th = jnp.tanh(gates)
        i_g = sg[:, 0 * H:1 * H]
        f_g = sg[:, 1 * H:2 * H]
        g_g = th[:, 2 * H:3 * H]
        o_g = sg[:, 3 * H:4 * H]
        c = f_g * c_prev + i_g * g_g
        h = o_g * jnp.tanh(c)
        return h, c

    zeros = jnp.zeros((B, H), jnp.float32)
    h_f, c_f, acc_f = zeros, zeros, zeros
    h_b, c_b, acc_b = zeros, zeros, zeros

    # merged forward/backward directions, fully unrolled (S is a static Python int)
    for t in range(S):
        gx_f = gates_x[t * B:(t + 1) * B, :4 * H]                   # (B, 4H)
        gx_b = gates_x[(S - 1 - t) * B:(S - t) * B, 4 * H:]         # (B, 4H), reversed time
        gf = gx_f + jnp.dot(h_f, whh_f, preferred_element_type=jnp.float32) + b_f
        gb = gx_b + jnp.dot(h_b, whh_b, preferred_element_type=jnp.float32) + b_b
        h_f, c_f = cell(gf, c_f)
        h_b, c_b = cell(gb, c_b)
        acc_f = acc_f + h_f
        acc_b = acc_b + h_b

    out_sum = jnp.concatenate([acc_f, acc_b], axis=1)               # (B, 2H)  sum_t output

    # exact reproduction of:
    #   hidden = mean(reshape(hidden(2,B,H), [B, -1, 2H]), dim=1)   (middle dim is 1)
    # flat order = [h_f rows..., h_b rows...], regrouped 2H per output row.
    pieces = [h_f[b:b + 1, :] for b in range(B)] + [h_b[b:b + 1, :] for b in range(B)]
    rows = [jnp.concatenate(pieces[2 * i:2 * i + 2], axis=1) for i in range(B)]
    hidden_mean = jnp.concatenate(rows, axis=0)                     # (B, 2H)

    # dropout == identity (eval mode)
    fc_in = jnp.concatenate([out_sum + hidden_mean, cls], axis=1)   # (B, 2H + D)
    logits = jnp.dot(fc_in, wfc_ref[...], preferred_element_type=jnp.float32) + bfc_ref[...]

    # lane-dense packed output: [fc_in | logits | zero pad] -> (B, 128)
    pad = jnp.zeros((B, OUT_LANES - FC_IN - CLASS_NUM), jnp.float32)
    out_ref[...] = jnp.concatenate([fc_in, logits, pad], axis=1)


# ---------------- wrapper ----------------
def forward(input_ids, attention_masks, text_lengths, p):
    del text_lengths  # unused in the PyTorch forward as well

    # glue (XLA): embedding gather + positional embeddings, time-major flatten
    # TODO(synk): embedding row-gather kept in XLA; an in-kernel DMA gather is not
    # worthwhile at these shapes.
    emb = p['word_emb'][input_ids] + p['pos_emb'][None, :, :]          # (B, S, D)
    x_tm = jnp.transpose(emb, (1, 0, 2)).reshape(S * B, D)             # (S*B, D), row = s*B+b

    # block-diagonal attention mask in the same time-major row order:
    # mask[sq*B+bq, sk*B+bk] = (bq == bk) * attention_masks[bk, sk]
    am_t = attention_masks.astype(jnp.float32).T                       # (S, B)
    eye_b = jnp.eye(B, dtype=jnp.float32)
    m4 = eye_b[None, :, None, :] * am_t[None, None, :, :]              # (1, B, S, B)
    mask_full = jnp.broadcast_to(m4, (S, B, S, B)).reshape(S * B, S * B)

    wih_all = jnp.concatenate([p['wih_f'], p['wih_b']], axis=1)        # (D, 8H)

    slab = pl.pallas_call(
        fused_kernel,
        out_shape=jax.ShapeDtypeStruct((B, OUT_LANES), jnp.float32),
    )(x_tm, mask_full,
      p['ln0g'], p['ln0b'], p['wqkv'], p['bqkv'], p['wo'], p['bo'],
      p['ln1g'], p['ln1b'], p['w1'], p['b1'], p['w2'], p['b2'],
      p['ln2g'], p['ln2b'], p['wp'], p['bp'],
      wih_all, p['whh_f'], p['whh_b'], p['b_f'], p['b_b'],
      p['wfc'], p['bfc'])

    fc_input = slab[:, :FC_IN]
    logits = slab[:, FC_IN:FC_IN + CLASS_NUM]
    return logits, fc_input


# ---------------- deterministic parameter init ----------------
def init_params(key):
    ks = iter(jax.random.split(key, 32))

    def nrm(shape, scale=0.02):
        return scale * jax.random.normal(next(ks), shape, dtype=jnp.float32)

    p = {
        'word_emb': nrm((VOCAB, D)),
        'pos_emb': nrm((S, D)),
        'ln0g': jnp.ones((1, D), jnp.float32), 'ln0b': jnp.zeros((1, D), jnp.float32),
        'wqkv': nrm((D, 3 * D)), 'bqkv': jnp.zeros((1, 3 * D), jnp.float32),
        'wo': nrm((D, D)), 'bo': jnp.zeros((1, D), jnp.float32),
        'ln1g': jnp.ones((1, D), jnp.float32), 'ln1b': jnp.zeros((1, D), jnp.float32),
        'w1': nrm((D, FFN)), 'b1': jnp.zeros((1, FFN), jnp.float32),
        'w2': nrm((FFN, D)), 'b2': jnp.zeros((1, D), jnp.float32),
        'ln2g': jnp.ones((1, D), jnp.float32), 'ln2b': jnp.zeros((1, D), jnp.float32),
        'wp': nrm((D, D)), 'bp': jnp.zeros((1, D), jnp.float32),
        # LSTM (gate order i, f, g, o as in PyTorch; b = b_ih + b_hh folded)
        'wih_f': nrm((D, 4 * H), 0.1), 'whh_f': nrm((H, 4 * H), 0.1),
        'b_f': jnp.zeros((1, 4 * H), jnp.float32),
        'wih_b': nrm((D, 4 * H), 0.1), 'whh_b': nrm((H, 4 * H), 0.1),
        'b_b': jnp.zeros((1, 4 * H), jnp.float32),
        # final FC: (in_features, class_num) layout (already transposed vs torch)
        'wfc': nrm((2 * H + D, CLASS_NUM), 0.1),
        'bfc': jnp.zeros((1, CLASS_NUM), jnp.float32),
    }
    return p


if __name__ == "__main__":
    key = jax.random.PRNGKey(0)
    pkey, dkey = jax.random.split(key)
    params = init_params(pkey)

    input_ids = jax.random.randint(dkey, (B, S), 0, VOCAB, dtype=jnp.int32)
    attention_masks = jnp.ones((B, S), jnp.float32).at[1, 6:].set(0.0)
    text_lengths = jnp.array([S, 6], jnp.int32)   # unused by forward (as in PyTorch)

    logits, fc_input = jax.jit(forward)(input_ids, attention_masks, text_lengths, params)
    jax.block_until_ready((logits, fc_input))

    assert logits.shape == (B, CLASS_NUM)
    assert fc_input.shape == (B, FC_IN)
    assert bool(jnp.all(jnp.isfinite(logits))) and bool(jnp.all(jnp.isfinite(fc_input)))
    print("KERNEL_OK")
</pallas_src>

<mosaic_0001>
module attributes {stable_mosaic.version = 11 : i64} {
  func.func @fused_kernel(%arg0: memref<16x32xf32, #tpu.memory_space<vmem>>, %arg1: memref<16x16xf32, #tpu.memory_space<vmem>>, %arg2: memref<1x32xf32, #tpu.memory_space<vmem>>, %arg3: memref<1x32xf32, #tpu.memory_space<vmem>>, %arg4: memref<32x96xf32, #tpu.memory_space<vmem>>, %arg5: memref<1x96xf32, #tpu.memory_space<vmem>>, %arg6: memref<32x32xf32, #tpu.memory_space<vmem>>, %arg7: memref<1x32xf32, #tpu.memory_space<vmem>>, %arg8: memref<1x32xf32, #tpu.memory_space<vmem>>, %arg9: memref<1x32xf32, #tpu.memory_space<vmem>>, %arg10: memref<32x64xf32, #tpu.memory_space<vmem>>, %arg11: memref<1x64xf32, #tpu.memory_space<vmem>>, %arg12: memref<64x32xf32, #tpu.memory_space<vmem>>, %arg13: memref<1x32xf32, #tpu.memory_space<vmem>>, %arg14: memref<1x32xf32, #tpu.memory_space<vmem>>, %arg15: memref<1x32xf32, #tpu.memory_space<vmem>>, %arg16: memref<32x32xf32, #tpu.memory_space<vmem>>, %arg17: memref<1x32xf32, #tpu.memory_space<vmem>>, %arg18: memref<32x256xf32, #tpu.memory_space<vmem>>, %arg19: memref<32x128xf32, #tpu.memory_space<vmem>>, %arg20: memref<32x128xf32, #tpu.memory_space<vmem>>, %arg21: memref<1x128xf32, #tpu.memory_space<vmem>>, %arg22: memref<1x128xf32, #tpu.memory_space<vmem>>, %arg23: memref<96x5xf32, #tpu.memory_space<vmem>>, %arg24: memref<1x5xf32, #tpu.memory_space<vmem>>, %arg25: memref<2x128xf32, #tpu.memory_space<vmem>>) attributes {dimension_semantics = [], scalar_prefetch = 0 : i64, scratch_operands = 0 : i64, tpu.core_type = #tpu.core_type<tc>} {
    %c0 = arith.constant 0 : index
    %c0_0 = arith.constant 0 : index
    %0 = vector.load %arg0[%c0, %c0_0] : memref<16x32xf32, #tpu.memory_space<vmem>>, vector<16x32xf32>
    %c0_1 = arith.constant 0 : index
    %c0_2 = arith.constant 0 : index
    %1 = vector.load %arg1[%c0_1, %c0_2] : memref<16x16xf32, #tpu.memory_space<vmem>>, vector<16x16xf32>
    %c0_3 = arith.constant 0 : index
    %c0_4 = arith.constant 0 : index
    %2 = vector.load %arg2[%c0_3, %c0_4] : memref<1x32xf32, #tpu.memory_space<vmem>>, vector<1x32xf32>
    %c0_5 = arith.constant 0 : index
    %c0_6 = arith.constant 0 : index
    %3 = vector.load %arg3[%c0_5, %c0_6] : memref<1x32xf32, #tpu.memory_space<vmem>>, vector<1x32xf32>
    %cst = arith.constant dense<0.000000e+00> : vector<16xf32>
    %4 = vector.multi_reduction <add>, %0, %cst [1] : vector<16x32xf32> to vector<16xf32>
    %5 = vector.shape_cast %4 : vector<16xf32> to vector<16x1xf32>
    %cst_7 = arith.constant 3.200000e+01 : f32
    %6 = vector.broadcast %cst_7 : f32 to vector<16x1xf32>
    %7 = arith.divf %5, %6 : vector<16x1xf32>
    %8 = vector.broadcast %7 : vector<16x1xf32> to vector<16x32xf32>
    %9 = arith.subf %0, %8 : vector<16x32xf32>
    %10 = arith.mulf %9, %9 : vector<16x32xf32>
    %cst_8 = arith.constant dense<0.000000e+00> : vector<16xf32>
    %11 = vector.multi_reduction <add>, %10, %cst_8 [1] : vector<16x32xf32> to vector<16xf32>
    %12 = vector.shape_cast %11 : vector<16xf32> to vector<16x1xf32>
    %cst_9 = arith.constant 3.200000e+01 : f32
    %13 = vector.broadcast %cst_9 : f32 to vector<16x1xf32>
    %14 = arith.divf %12, %13 : vector<16x1xf32>
    %15 = vector.broadcast %7 : vector<16x1xf32> to vector<16x32xf32>
    %16 = arith.subf %0, %15 : vector<16x32xf32>
    %cst_10 = arith.constant 9.99999996E-13 : f32
    %17 = vector.broadcast %cst_10 : f32 to vector<16x1xf32>
    %18 = arith.addf %14, %17 : vector<16x1xf32>
    %19 = math.rsqrt %18 : vector<16x1xf32>
    %20 = vector.broadcast %19 : vector<16x1xf32> to vector<16x32xf32>
    %21 = arith.mulf %16, %20 : vector<16x32xf32>
    %22 = vector.broadcast %2 : vector<1x32xf32> to vector<16x32xf32>
    %23 = arith.mulf %21, %22 : vector<16x32xf32>
    %24 = vector.broadcast %3 : vector<1x32xf32> to vector<16x32xf32>
    %25 = arith.addf %23, %24 : vector<16x32xf32>
    %c0_11 = arith.constant 0 : index
    %c0_12 = arith.constant 0 : index
    %26 = vector.load %arg4[%c0_11, %c0_12] : memref<32x96xf32, #tpu.memory_space<vmem>>, vector<32x96xf32>
    %cst_13 = arith.constant dense<0.000000e+00> : vector<16x96xf32>
    %27 = tpu.matmul %25, %26, %cst_13 {dimension_numbers = #tpu.dot_dimension_numbers<[1], [0], [0], [1], [0, 0, 1, 1], [], []>} : vector<16x32xf32>, vector<32x96xf32>, vector<16x96xf32> -> vector<16x96xf32>
    %c0_14 = arith.constant 0 : index
    %c0_15 = arith.constant 0 : index
    %28 = vector.load %arg5[%c0_14, %c0_15] : memref<1x96xf32, #tpu.memory_space<vmem>>, vector<1x96xf32>
    %29 = vector.broadcast %28 : vector<1x96xf32> to vector<16x96xf32>
    %30 = arith.addf %27, %29 : vector<16x96xf32>
    %31 = vector.extract_strided_slice %30 {offsets = [0, 0], sizes = [16, 32], strides = [1, 1]} : vector<16x96xf32> to vector<16x32xf32>
    %32 = vector.extract_strided_slice %30 {offsets = [0, 32], sizes = [16, 32], strides = [1, 1]} : vector<16x96xf32> to vector<16x32xf32>
    %33 = vector.extract_strided_slice %30 {offsets = [0, 64], sizes = [16, 32], strides = [1, 1]} : vector<16x96xf32> to vector<16x32xf32>
    %34 = tpu.transpose %32, [1, 0] : vector<16x32xf32> -> vector<32x16xf32>
    %cst_16 = arith.constant dense<0.000000e+00> : vector<16x16xf32>
    %35 = tpu.matmul %31, %34, %cst_16 {dimension_numbers = #tpu.dot_dimension_numbers<[1], [0], [0], [1], [0, 0, 1, 1], [], []>} : vector<16x32xf32>, vector<32x16xf32>, vector<16x16xf32> -> vector<16x16xf32>
    %cst_17 = arith.constant 0.176776692 : f32
    %36 = vector.broadcast %cst_17 : f32 to vector<16x16xf32>
    %37 = arith.mulf %35, %36 : vector<16x16xf32>
    %cst_18 = arith.constant 1.000000e+00 : f32
    %38 = vector.broadcast %cst_18 : f32 to vector<16x16xf32>
    %39 = arith.subf %38, %1 : vector<16x16xf32>
    %cst_19 = arith.constant -1.000000e+09 : f32
    %40 = vector.broadcast %cst_19 : f32 to vector<16x16xf32>
    %41 = arith.mulf %39, %40 : vector<16x16xf32>
    %42 = arith.addf %37, %41 : vector<16x16xf32>
    %cst_20 = arith.constant dense<0xFF800000> : vector<16xf32>
    %43 = vector.multi_reduction <maximumf>, %42, %cst_20 [1] : vector<16x16xf32> to vector<16xf32>
    %cst_21 = arith.constant 0xFF800000 : f32
    %44 = vector.broadcast %cst_21 : f32 to vector<16xf32>
    %45 = arith.maximumf %44, %43 : vector<16xf32>
    %46 = vector.shape_cast %45 : vector<16xf32> to vector<16x1xf32>
    %47 = vector.broadcast %46 : vector<16x1xf32> to vector<16x16xf32>
    %48 = arith.subf %42, %47 : vector<16x16xf32>
    %49 = math.exp %48 : vector<16x16xf32>
    %cst_22 = arith.constant dense<0.000000e+00> : vector<16xf32>
    %50 = vector.multi_reduction <add>, %49, %cst_22 [1] : vector<16x16xf32> to vector<16xf32>
    %51 = vector.shape_cast %50 : vector<16xf32> to vector<16x1xf32>
    %52 = vector.broadcast %51 : vector<16x1xf32> to vector<16x16xf32>
    %53 = arith.divf %49, %52 : vector<16x16xf32>
    %cst_23 = arith.constant dense<0.000000e+00> : vector<16x32xf32>
    %54 = tpu.matmul %53, %33, %cst_23 {dimension_numbers = #tpu.dot_dimension_numbers<[1], [0], [0], [1], [0, 0, 1, 1], [], []>} : vector<16x16xf32>, vector<16x32xf32>, vector<16x32xf32> -> vector<16x32xf32>
    %c0_24 = arith.constant 0 : index
    %c0_25 = arith.constant 0 : index
    %55 = vector.load %arg6[%c0_24, %c0_25] : memref<32x32xf32, #tpu.memory_space<vmem>>, vector<32x32xf32>
    %cst_26 = arith.constant dense<0.000000e+00> : vector<16x32xf32>
    %56 = tpu.matmul %54, %55, %cst_26 {dimension_numbers = #tpu.dot_dimension_numbers<[1], [0], [0], [1], [0, 0, 1, 1], [], []>} : vector<16x32xf32>, vector<32x32xf32>, vector<16x32xf32> -> vector<16x32xf32>
    %c0_27 = arith.constant 0 : index
    %c0_28 = arith.constant 0 : index
    %57 = vector.load %arg7[%c0_27, %c0_28] : memref<1x32xf32, #tpu.memory_space<vmem>>, vector<1x32xf32>
    %58 = vector.broadcast %57 : vector<1x32xf32> to vector<16x32xf32>
    %59 = arith.addf %56, %58 : vector<16x32xf32>
    %60 = arith.addf %25, %59 : vector<16x32xf32>
    %c0_29 = arith.constant 0 : index
    %c0_30 = arith.constant 0 : index
    %61 = vector.load %arg8[%c0_29, %c0_30] : memref<1x32xf32, #tpu.memory_space<vmem>>, vector<1x32xf32>
    %c0_31 = arith.constant 0 : index
    %c0_32 = arith.constant 0 : index
    %62 = vector.load %arg9[%c0_31, %c0_32] : memref<1x32xf32, #tpu.memory_space<vmem>>, vector<1x32xf32>
    %cst_33 = arith.constant dense<0.000000e+00> : vector<16xf32>
    %63 = vector.multi_reduction <add>, %60, %cst_33 [1] : vector<16x32xf32> to vector<16xf32>
    %64 = vector.shape_cast %63 : vector<16xf32> to vector<16x1xf32>
    %cst_34 = arith.constant 3.200000e+01 : f32
    %65 = vector.broadcast %cst_34 : f32 to vector<16x1xf32>
    %66 = arith.divf %64, %65 : vector<16x1xf32>
    %67 = vector.broadcast %66 : vector<16x1xf32> to vector<16x32xf32>
    %68 = arith.subf %60, %67 : vector<16x32xf32>
    %69 = arith.mulf %68, %68 : vector<16x32xf32>
    %cst_35 = arith.constant dense<0.000000e+00> : vector<16xf32>
    %70 = vector.multi_reduction <add>, %69, %cst_35 [1] : vector<16x32xf32> to vector<16xf32>
    %71 = vector.shape_cast %70 : vector<16xf32> to vector<16x1xf32>
    %cst_36 = arith.constant 3.200000e+01 : f32
    %72 = vector.broadcast %cst_36 : f32 to vector<16x1xf32>
    %73 = arith.divf %71, %72 : vector<16x1xf32>
    %74 = vector.broadcast %66 : vector<16x1xf32> to vector<16x32xf32>
    %75 = arith.subf %60, %74 : vector<16x32xf32>
    %cst_37 = arith.constant 9.99999996E-13 : f32
    %76 = vector.broadcast %cst_37 : f32 to vector<16x1xf32>
    %77 = arith.addf %73, %76 : vector<16x1xf32>
    %78 = math.rsqrt %77 : vector<16x1xf32>
    %79 = vector.broadcast %78 : vector<16x1xf32> to vector<16x32xf32>
    %80 = arith.mulf %75, %79 : vector<16x32xf32>
    %81 = vector.broadcast %61 : vector<1x32xf32> to vector<16x32xf32>
    %82 = arith.mulf %80, %81 : vector<16x32xf32>
    %83 = vector.broadcast %62 : vector<1x32xf32> to vector<16x32xf32>
    %84 = arith.addf %82, %83 : vector<16x32xf32>
    %c0_38 = arith.constant 0 : index
    %c0_39 = arith.constant 0 : index
    %85 = vector.load %arg10[%c0_38, %c0_39] : memref<32x64xf32, #tpu.memory_space<vmem>>, vector<32x64xf32>
    %cst_40 = arith.constant dense<0.000000e+00> : vector<16x64xf32>
    %86 = tpu.matmul %84, %85, %cst_40 {dimension_numbers = #tpu.dot_dimension_numbers<[1], [0], [0], [1], [0, 0, 1, 1], [], []>} : vector<16x32xf32>, vector<32x64xf32>, vector<16x64xf32> -> vector<16x64xf32>
    %c0_41 = arith.constant 0 : index
    %c0_42 = arith.constant 0 : index
    %87 = vector.load %arg11[%c0_41, %c0_42] : memref<1x64xf32, #tpu.memory_space<vmem>>, vector<1x64xf32>
    %88 = vector.broadcast %87 : vector<1x64xf32> to vector<16x64xf32>
    %89 = arith.addf %86, %88 : vector<16x64xf32>
    %cst_43 = arith.constant 0.000000e+00 : f32
    %90 = vector.broadcast %cst_43 : f32 to vector<16x64xf32>
    %91 = arith.maximumf %89, %90 : vector<16x64xf32>
    %c0_44 = arith.constant 0 : index
    %c0_45 = arith.constant 0 : index
    %92 = vector.load %arg12[%c0_44, %c0_45] : memref<64x32xf32, #tpu.memory_space<vmem>>, vector<64x32xf32>
    %cst_46 = arith.constant dense<0.000000e+00> : vector<16x32xf32>
    %93 = tpu.matmul %91, %92, %cst_46 {dimension_numbers = #tpu.dot_dimension_numbers<[1], [0], [0], [1], [0, 0, 1, 1], [], []>} : vector<16x64xf32>, vector<64x32xf32>, vector<16x32xf32> -> vector<16x32xf32>
    %c0_47 = arith.constant 0 : index
    %c0_48 = arith.constant 0 : index
    %94 = vector.load %arg13[%c0_47, %c0_48] : memref<1x32xf32, #tpu.memory_space<vmem>>, vector<1x32xf32>
    %95 = vector.broadcast %94 : vector<1x32xf32> to vector<16x32xf32>
    %96 = arith.addf %93, %95 : vector<16x32xf32>
    %97 = arith.addf %84, %96 : vector<16x32xf32>
    %c0_49 = arith.constant 0 : index
    %c0_50 = arith.constant 0 : index
    %98 = vector.load %arg14[%c0_49, %c0_50] : memref<1x32xf32, #tpu.memory_space<vmem>>, vector<1x32xf32>
    %c0_51 = arith.constant 0 : index
    %c0_52 = arith.constant 0 : index
    %99 = vector.load %arg15[%c0_51, %c0_52] : memref<1x32xf32, #tpu.memory_space<vmem>>, vector<1x32xf32>
    %cst_53 = arith.constant dense<0.000000e+00> : vector<16xf32>
    %100 = vector.multi_reduction <add>, %97, %cst_53 [1] : vector<16x32xf32> to vector<16xf32>
    %101 = vector.shape_cast %100 : vector<16xf32> to vector<16x1xf32>
    %cst_54 = arith.constant 3.200000e+01 : f32
    %102 = vector.broadcast %cst_54 : f32 to vector<16x1xf32>
    %103 = arith.divf %101, %102 : vector<16x1xf32>
    %104 = vector.broadcast %103 : vector<16x1xf32> to vector<16x32xf32>
    %105 = arith.subf %97, %104 : vector<16x32xf32>
    %106 = arith.mulf %105, %105 : vector<16x32xf32>
    %cst_55 = arith.constant dense<0.000000e+00> : vector<16xf32>
    %107 = vector.multi_reduction <add>, %106, %cst_55 [1] : vector<16x32xf32> to vector<16xf32>
    %108 = vector.shape_cast %107 : vector<16xf32> to vector<16x1xf32>
    %cst_56 = arith.constant 3.200000e+01 : f32
    %109 = vector.broadcast %cst_56 : f32 to vector<16x1xf32>
    %110 = arith.divf %108, %109 : vector<16x1xf32>
    %111 = vector.broadcast %103 : vector<16x1xf32> to vector<16x32xf32>
    %112 = arith.subf %97, %111 : vector<16x32xf32>
    %cst_57 = arith.constant 9.99999996E-13 : f32
    %113 = vector.broadcast %cst_57 : f32 to vector<16x1xf32>
    %114 = arith.addf %110, %113 : vector<16x1xf32>
    %115 = math.rsqrt %114 : vector<16x1xf32>
    %116 = vector.broadcast %115 : vector<16x1xf32> to vector<16x32xf32>
    %117 = arith.mulf %112, %116 : vector<16x32xf32>
    %118 = vector.broadcast %98 : vector<1x32xf32> to vector<16x32xf32>
    %119 = arith.mulf %117, %118 : vector<16x32xf32>
    %120 = vector.broadcast %99 : vector<1x32xf32> to vector<16x32xf32>
    %121 = arith.addf %119, %120 : vector<16x32xf32>
    %122 = vector.extract_strided_slice %121 {offsets = [0, 0], sizes = [2, 32], strides = [1, 1]} : vector<16x32xf32> to vector<2x32xf32>
    %c0_58 = arith.constant 0 : index
    %c0_59 = arith.constant 0 : index
    %123 = vector.load %arg16[%c0_58, %c0_59] : memref<32x32xf32, #tpu.memory_space<vmem>>, vector<32x32xf32>
    %cst_60 = arith.constant dense<0.000000e+00> : vector<2x32xf32>
    %124 = tpu.matmul %122, %123, %cst_60 {dimension_numbers = #tpu.dot_dimension_numbers<[1], [0], [0], [1], [0, 0, 1, 1], [], []>} : vector<2x32xf32>, vector<32x32xf32>, vector<2x32xf32> -> vector<2x32xf32>
    %c0_61 = arith.constant 0 : index
    %c0_62 = arith.constant 0 : index
    %125 = vector.load %arg17[%c0_61, %c0_62] : memref<1x32xf32, #tpu.memory_space<vmem>>, vector<1x32xf32>
    %126 = vector.broadcast %125 : vector<1x32xf32> to vector<2x32xf32>
    %127 = arith.addf %124, %126 : vector<2x32xf32>
    %128 = math.tanh %127 : vector<2x32xf32>
    %c0_63 = arith.constant 0 : index
    %c0_64 = arith.constant 0 : index
    %129 = vector.load %arg18[%c0_63, %c0_64] : memref<32x256xf32, #tpu.memory_space<vmem>>, vector<32x256xf32>
    %cst_65 = arith.constant dense<0.000000e+00> : vector<16x256xf32>
    %130 = tpu.matmul %121, %129, %cst_65 {dimension_numbers = #tpu.dot_dimension_numbers<[1], [0], [0], [1], [0, 0, 1, 1], [], []>} : vector<16x32xf32>, vector<32x256xf32>, vector<16x256xf32> -> vector<16x256xf32>
    %c0_66 = arith.constant 0 : index
    %c0_67 = arith.constant 0 : index
    %131 = vector.load %arg19[%c0_66, %c0_67] : memref<32x128xf32, #tpu.memory_space<vmem>>, vector<32x128xf32>
    %c0_68 = arith.constant 0 : index
    %c0_69 = arith.constant 0 : index
    %132 = vector.load %arg20[%c0_68, %c0_69] : memref<32x128xf32, #tpu.memory_space<vmem>>, vector<32x128xf32>
    %c0_70 = arith.constant 0 : index
    %c0_71 = arith.constant 0 : index
    %133 = vector.load %arg21[%c0_70, %c0_71] : memref<1x128xf32, #tpu.memory_space<vmem>>, vector<1x128xf32>
    %c0_72 = arith.constant 0 : index
    %c0_73 = arith.constant 0 : index
    %134 = vector.load %arg22[%c0_72, %c0_73] : memref<1x128xf32, #tpu.memory_space<vmem>>, vector<1x128xf32>
    %cst_74 = arith.constant 0.000000e+00 : f32
    %135 = vector.broadcast %cst_74 : f32 to vector<2x32xf32>
    %136 = vector.extract_strided_slice %130 {offsets = [0, 0], sizes = [2, 128], strides = [1, 1]} : vector<16x256xf32> to vector<2x128xf32>
    %137 = vector.extract_strided_slice %130 {offsets = [14, 128], sizes = [2, 128], strides = [1, 1]} : vector<16x256xf32> to vector<2x128xf32>
    %cst_75 = arith.constant dense<0.000000e+00> : vector<2x128xf32>
    %138 = tpu.matmul %135, %131, %cst_75 {dimension_numbers = #tpu.dot_dimension_numbers<[1], [0], [0], [1], [0, 0, 1, 1], [], []>} : vector<2x32xf32>, vector<32x128xf32>, vector<2x128xf32> -> vector<2x128xf32>
    %139 = arith.addf %136, %138 : vector<2x128xf32>
    %140 = vector.broadcast %133 : vector<1x128xf32> to vector<2x128xf32>
    %141 = arith.addf %139, %140 : vector<2x128xf32>
    %cst_76 = arith.constant dense<0.000000e+00> : vector<2x128xf32>
    %142 = tpu.matmul %135, %132, %cst_76 {dimension_numbers = #tpu.dot_dimension_numbers<[1], [0], [0], [1], [0, 0, 1, 1], [], []>} : vector<2x32xf32>, vector<32x128xf32>, vector<2x128xf32> -> vector<2x128xf32>
    %143 = arith.addf %137, %142 : vector<2x128xf32>
    %144 = vector.broadcast %134 : vector<1x128xf32> to vector<2x128xf32>
    %145 = arith.addf %143, %144 : vector<2x128xf32>
    %146 = arith.negf %141 : vector<2x128xf32>
    %147 = math.exp %146 : vector<2x128xf32>
    %cst_77 = arith.constant 1.000000e+00 : f32
    %148 = vector.broadcast %cst_77 : f32 to vector<2x128xf32>
    %149 = arith.addf %148, %147 : vector<2x128xf32>
    %150 = arith.divf %148, %149 : vector<2x128xf32>
    %151 = math.tanh %141 : vector<2x128xf32>
    %152 = vector.extract_strided_slice %150 {offsets = [0, 0], sizes = [2, 32], strides = [1, 1]} : vector<2x128xf32> to vector<2x32xf32>
    %153 = vector.extract_strided_slice %150 {offsets = [0, 32], sizes = [2, 32], strides = [1, 1]} : vector<2x128xf32> to vector<2x32xf32>
    %154 = vector.extract_strided_slice %151 {offsets = [0, 64], sizes = [2, 32], strides = [1, 1]} : vector<2x128xf32> to vector<2x32xf32>
    %155 = vector.extract_strided_slice %150 {offsets = [0, 96], sizes = [2, 32], strides = [1, 1]} : vector<2x128xf32> to vector<2x32xf32>
    %156 = arith.mulf %153, %135 : vector<2x32xf32>
    %157 = arith.mulf %152, %154 : vector<2x32xf32>
    %158 = arith.addf %156, %157 : vector<2x32xf32>
    %159 = math.tanh %158 : vector<2x32xf32>
    %160 = arith.mulf %155, %159 : vector<2x32xf32>
    %161 = arith.negf %145 : vector<2x128xf32>
    %162 = math.exp %161 : vector<2x128xf32>
    %cst_78 = arith.constant 1.000000e+00 : f32
    %163 = vector.broadcast %cst_78 : f32 to vector<2x128xf32>
    %164 = arith.addf %163, %162 : vector<2x128xf32>
    %165 = arith.divf %163, %164 : vector<2x128xf32>
    %166 = math.tanh %145 : vector<2x128xf32>
    %167 = vector.extract_strided_slice %165 {offsets = [0, 0], sizes = [2, 32], strides = [1, 1]} : vector<2x128xf32> to vector<2x32xf32>
    %168 = vector.extract_strided_slice %165 {offsets = [0, 32], sizes = [2, 32], strides = [1, 1]} : vector<2x128xf32> to vector<2x32xf32>
    %169 = vector.extract_strided_slice %166 {offsets = [0, 64], sizes = [2, 32], strides = [1, 1]} : vector<2x128xf32> to vector<2x32xf32>
    %170 = vector.extract_strided_slice %165 {offsets = [0, 96], sizes = [2, 32], strides = [1, 1]} : vector<2x128xf32> to vector<2x32xf32>
    %171 = arith.mulf %168, %135 : vector<2x32xf32>
    %172 = arith.mulf %167, %169 : vector<2x32xf32>
    %173 = arith.addf %171, %172 : vector<2x32xf32>
    %174 = math.tanh %173 : vector<2x32xf32>
    %175 = arith.mulf %170, %174 : vector<2x32xf32>
    %176 = arith.addf %135, %160 : vector<2x32xf32>
    %177 = arith.addf %135, %175 : vector<2x32xf32>
    %178 = vector.extract_strided_slice %130 {offsets = [2, 0], sizes = [2, 128], strides = [1, 1]} : vector<16x256xf32> to vector<2x128xf32>
    %179 = vector.extract_strided_slice %130 {offsets = [12, 128], sizes = [2, 128], strides = [1, 1]} : vector<16x256xf32> to vector<2x128xf32>
    %cst_79 = arith.constant dense<0.000000e+00> : vector<2x128xf32>
    %180 = tpu.matmul %160, %131, %cst_79 {dimension_numbers = #tpu.dot_dimension_numbers<[1], [0], [0], [1], [0, 0, 1, 1], [], []>} : vector<2x32xf32>, vector<32x128xf32>, vector<2x128xf32> -> vector<2x128xf32>
    %181 = arith.addf %178, %180 : vector<2x128xf32>
    %182 = vector.broadcast %133 : vector<1x128xf32> to vector<2x128xf32>
    %183 = arith.addf %181, %182 : vector<2x128xf32>
    %cst_80 = arith.constant dense<0.000000e+00> : vector<2x128xf32>
    %184 = tpu.matmul %175, %132, %cst_80 {dimension_numbers = #tpu.dot_dimension_numbers<[1], [0], [0], [1], [0, 0, 1, 1], [], []>} : vector<2x32xf32>, vector<32x128xf32>, vector<2x128xf32> -> vector<2x128xf32>
    %185 = arith.addf %179, %184 : vector<2x128xf32>
    %186 = vector.broadcast %134 : vector<1x128xf32> to vector<2x128xf32>
    %187 = arith.addf %185, %186 : vector<2x128xf32>
    %188 = arith.negf %183 : vector<2x128xf32>
    %189 = math.exp %188 : vector<2x128xf32>
    %cst_81 = arith.constant 1.000000e+00 : f32
    %190 = vector.broadcast %cst_81 : f32 to vector<2x128xf32>
    %191 = arith.addf %190, %189 : vector<2x128xf32>
    %192 = arith.divf %190, %191 : vector<2x128xf32>
    %193 = math.tanh %183 : vector<2x128xf32>
    %194 = vector.extract_strided_slice %192 {offsets = [0, 0], sizes = [2, 32], strides = [1, 1]} : vector<2x128xf32> to vector<2x32xf32>
    %195 = vector.extract_strided_slice %192 {offsets = [0, 32], sizes = [2, 32], strides = [1, 1]} : vector<2x128xf32> to vector<2x32xf32>
    %196 = vector.extract_strided_slice %193 {offsets = [0, 64], sizes = [2, 32], strides = [1, 1]} : vector<2x128xf32> to vector<2x32xf32>
    %197 = vector.extract_strided_slice %192 {offsets = [0, 96], sizes = [2, 32], strides = [1, 1]} : vector<2x128xf32> to vector<2x32xf32>
    %198 = arith.mulf %195, %158 : vector<2x32xf32>
    %199 = arith.mulf %194, %196 : vector<2x32xf32>
    %200 = arith.addf %198, %199 : vector<2x32xf32>
    %201 = math.tanh %200 : vector<2x32xf32>
    %202 = arith.mulf %197, %201 : vector<2x32xf32>
    %203 = arith.negf %187 : vector<2x128xf32>
    %204 = math.exp %203 : vector<2x128xf32>
    %cst_82 = arith.constant 1.000000e+00 : f32
    %205 = vector.broadcast %cst_82 : f32 to vector<2x128xf32>
    %206 = arith.addf %205, %204 : vector<2x128xf32>
    %207 = arith.divf %205, %206 : vector<2x128xf32>
    %208 = math.tanh %187 : vector<2x128xf32>
    %209 = vector.extract_strided_slice %207 {offsets = [0, 0], sizes = [2, 32], strides = [1, 1]} : vector<2x128xf32> to vector<2x32xf32>
    %210 = vector.extract_strided_slice %207 {offsets = [0, 32], sizes = [2, 32], strides = [1, 1]} : vector<2x128xf32> to vector<2x32xf32>
    %211 = vector.extract_strided_slice %208 {offsets = [0, 64], sizes = [2, 32], strides = [1, 1]} : vector<2x128xf32> to vector<2x32xf32>
    %212 = vector.extract_strided_slice %207 {offsets = [0, 96], sizes = [2, 32], strides = [1, 1]} : vector<2x128xf32> to vector<2x32xf32>
    %213 = arith.mulf %210, %173 : vector<2x32xf32>
    %214 = arith.mulf %209, %211 : vector<2x32xf32>
    %215 = arith.addf %213, %214 : vector<2x32xf32>
    %216 = math.tanh %215 : vector<2x32xf32>
    %217 = arith.mulf %212, %216 : vector<2x32xf32>
    %218 = arith.addf %176, %202 : vector<2x32xf32>
    %219 = arith.addf %177, %217 : vector<2x32xf32>
    %220 = vector.extract_strided_slice %130 {offsets = [4, 0], sizes = [2, 128], strides = [1, 1]} : vector<16x256xf32> to vector<2x128xf32>
    %221 = vector.extract_strided_slice %130 {offsets = [10, 128], sizes = [2, 128], strides = [1, 1]} : vector<16x256xf32> to vector<2x128xf32>
    %cst_83 = arith.constant dense<0.000000e+00> : vector<2x128xf32>
    %222 = tpu.matmul %202, %131, %cst_83 {dimension_numbers = #tpu.dot_dimension_numbers<[1], [0], [0], [1], [0, 0, 1, 1], [], []>} : vector<2x32xf32>, vector<32x128xf32>, vector<2x128xf32> -> vector<2x128xf32>
    %223 = arith.addf %220, %222 : vector<2x128xf32>
    %224 = vector.broadcast %133 : vector<1x128xf32> to vector<2x128xf32>
    %225 = arith.addf %223, %224 : vector<2x128xf32>
    %cst_84 = arith.constant dense<0.000000e+00> : vector<2x128xf32>
    %226 = tpu.matmul %217, %132, %cst_84 {dimension_numbers = #tpu.dot_dimension_numbers<[1], [0], [0], [1], [0, 0, 1, 1], [], []>} : vector<2x32xf32>, vector<32x128xf32>, vector<2x128xf32> -> vector<2x128xf32>
    %227 = arith.addf %221, %226 : vector<2x128xf32>
    %228 = vector.broadcast %134 : vector<1x128xf32> to vector<2x128xf32>
    %229 = arith.addf %227, %228 : vector<2x128xf32>
    %230 = arith.negf %225 : vector<2x128xf32>
    %231 = math.exp %230 : vector<2x128xf32>
    %cst_85 = arith.constant 1.000000e+00 : f32
    %232 = vector.broadcast %cst_85 : f32 to vector<2x128xf32>
    %233 = arith.addf %232, %231 : vector<2x128xf32>
    %234 = arith.divf %232, %233 : vector<2x128xf32>
    %235 = math.tanh %225 : vector<2x128xf32>
    %236 = vector.extract_strided_slice %234 {offsets = [0, 0], sizes = [2, 32], strides = [1, 1]} : vector<2x128xf32> to vector<2x32xf32>
    %237 = vector.extract_strided_slice %234 {offsets = [0, 32], sizes = [2, 32], strides = [1, 1]} : vector<2x128xf32> to vector<2x32xf32>
    %238 = vector.extract_strided_slice %235 {offsets = [0, 64], sizes = [2, 32], strides = [1, 1]} : vector<2x128xf32> to vector<2x32xf32>
    %239 = vector.extract_strided_slice %234 {offsets = [0, 96], sizes = [2, 32], strides = [1, 1]} : vector<2x128xf32> to vector<2x32xf32>
    %240 = arith.mulf %237, %200 : vector<2x32xf32>
    %241 = arith.mulf %236, %238 : vector<2x32xf32>
    %242 = arith.addf %240, %241 : vector<2x32xf32>
    %243 = math.tanh %242 : vector<2x32xf32>
    %244 = arith.mulf %239, %243 : vector<2x32xf32>
    %245 = arith.negf %229 : vector<2x128xf32>
    %246 = math.exp %245 : vector<2x128xf32>
    %cst_86 = arith.constant 1.000000e+00 : f32
    %247 = vector.broadcast %cst_86 : f32 to vector<2x128xf32>
    %248 = arith.addf %247, %246 : vector<2x128xf32>
    %249 = arith.divf %247, %248 : vector<2x128xf32>
    %250 = math.tanh %229 : vector<2x128xf32>
    %251 = vector.extract_strided_slice %249 {offsets = [0, 0], sizes = [2, 32], strides = [1, 1]} : vector<2x128xf32> to vector<2x32xf32>
    %252 = vector.extract_strided_slice %249 {offsets = [0, 32], sizes = [2, 32], strides = [1, 1]} : vector<2x128xf32> to vector<2x32xf32>
    %253 = vector.extract_strided_slice %250 {offsets = [0, 64], sizes = [2, 32], strides = [1, 1]} : vector<2x128xf32> to vector<2x32xf32>
    %254 = vector.extract_strided_slice %249 {offsets = [0, 96], sizes = [2, 32], strides = [1, 1]} : vector<2x128xf32> to vector<2x32xf32>
    %255 = arith.mulf %252, %215 : vector<2x32xf32>
    %256 = arith.mulf %251, %253 : vector<2x32xf32>
    %257 = arith.addf %255, %256 : vector<2x32xf32>
    %258 = math.tanh %257 : vector<2x32xf32>
    %259 = arith.mulf %254, %258 : vector<2x32xf32>
    %260 = arith.addf %218, %244 : vector<2x32xf32>
    %261 = arith.addf %219, %259 : vector<2x32xf32>
    %262 = vector.extract_strided_slice %130 {offsets = [6, 0], sizes = [2, 128], strides = [1, 1]} : vector<16x256xf32> to vector<2x128xf32>
    %263 = vector.extract_strided_slice %130 {offsets = [8, 128], sizes = [2, 128], strides = [1, 1]} : vector<16x256xf32> to vector<2x128xf32>
    %cst_87 = arith.constant dense<0.000000e+00> : vector<2x128xf32>
    %264 = tpu.matmul %244, %131, %cst_87 {dimension_numbers = #tpu.dot_dimension_numbers<[1], [0], [0], [1], [0, 0, 1, 1], [], []>} : vector<2x32xf32>, vector<32x128xf32>, vector<2x128xf32> -> vector<2x128xf32>
    %265 = arith.addf %262, %264 : vector<2x128xf32>
    %266 = vector.broadcast %133 : vector<1x128xf32> to vector<2x128xf32>
    %267 = arith.addf %265, %266 : vector<2x128xf32>
    %cst_88 = arith.constant dense<0.000000e+00> : vector<2x128xf32>
    %268 = tpu.matmul %259, %132, %cst_88 {dimension_numbers = #tpu.dot_dimension_numbers<[1], [0], [0], [1], [0, 0, 1, 1], [], []>} : vector<2x32xf32>, vector<32x128xf32>, vector<2x128xf32> -> vector<2x128xf32>
    %269 = arith.addf %263, %268 : vector<2x128xf32>
    %270 = vector.broadcast %134 : vector<1x128xf32> to vector<2x128xf32>
    %271 = arith.addf %269, %270 : vector<2x128xf32>
    %272 = arith.negf %267 : vector<2x128xf32>
    %273 = math.exp %272 : vector<2x128xf32>
    %cst_89 = arith.constant 1.000000e+00 : f32
    %274 = vector.broadcast %cst_89 : f32 to vector<2x128xf32>
    %275 = arith.addf %274, %273 : vector<2x128xf32>
    %276 = arith.divf %274, %275 : vector<2x128xf32>
    %277 = math.tanh %267 : vector<2x128xf32>
    %278 = vector.extract_strided_slice %276 {offsets = [0, 0], sizes = [2, 32], strides = [1, 1]} : vector<2x128xf32> to vector<2x32xf32>
    %279 = vector.extract_strided_slice %276 {offsets = [0, 32], sizes = [2, 32], strides = [1, 1]} : vector<2x128xf32> to vector<2x32xf32>
    %280 = vector.extract_strided_slice %277 {offsets = [0, 64], sizes = [2, 32], strides = [1, 1]} : vector<2x128xf32> to vector<2x32xf32>
    %281 = vector.extract_strided_slice %276 {offsets = [0, 96], sizes = [2, 32], strides = [1, 1]} : vector<2x128xf32> to vector<2x32xf32>
    %282 = arith.mulf %279, %242 : vector<2x32xf32>
    %283 = arith.mulf %278, %280 : vector<2x32xf32>
    %284 = arith.addf %282, %283 : vector<2x32xf32>
    %285 = math.tanh %284 : vector<2x32xf32>
    %286 = arith.mulf %281, %285 : vector<2x32xf32>
    %287 = arith.negf %271 : vector<2x128xf32>
    %288 = math.exp %287 : vector<2x128xf32>
    %cst_90 = arith.constant 1.000000e+00 : f32
    %289 = vector.broadcast %cst_90 : f32 to vector<2x128xf32>
    %290 = arith.addf %289, %288 : vector<2x128xf32>
    %291 = arith.divf %289, %290 : vector<2x128xf32>
    %292 = math.tanh %271 : vector<2x128xf32>
    %293 = vector.extract_strided_slice %291 {offsets = [0, 0], sizes = [2, 32], strides = [1, 1]} : vector<2x128xf32> to vector<2x32xf32>
    %294 = vector.extract_strided_slice %291 {offsets = [0, 32], sizes = [2, 32], strides = [1, 1]} : vector<2x128xf32> to vector<2x32xf32>
    %295 = vector.extract_strided_slice %292 {offsets = [0, 64], sizes = [2, 32], strides = [1, 1]} : vector<2x128xf32> to vector<2x32xf32>
    %296 = vector.extract_strided_slice %291 {offsets = [0, 96], sizes = [2, 32], strides = [1, 1]} : vector<2x128xf32> to vector<2x32xf32>
    %297 = arith.mulf %294, %257 : vector<2x32xf32>
    %298 = arith.mulf %293, %295 : vector<2x32xf32>
    %299 = arith.addf %297, %298 : vector<2x32xf32>
    %300 = math.tanh %299 : vector<2x32xf32>
    %301 = arith.mulf %296, %300 : vector<2x32xf32>
    %302 = arith.addf %260, %286 : vector<2x32xf32>
    %303 = arith.addf %261, %301 : vector<2x32xf32>
    %304 = vector.extract_strided_slice %130 {offsets = [8, 0], sizes = [2, 128], strides = [1, 1]} : vector<16x256xf32> to vector<2x128xf32>
    %305 = vector.extract_strided_slice %130 {offsets = [6, 128], sizes = [2, 128], strides = [1, 1]} : vector<16x256xf32> to vector<2x128xf32>
    %cst_91 = arith.constant dense<0.000000e+00> : vector<2x128xf32>
    %306 = tpu.matmul %286, %131, %cst_91 {dimension_numbers = #tpu.dot_dimension_numbers<[1], [0], [0], [1], [0, 0, 1, 1], [], []>} : vector<2x32xf32>, vector<32x128xf32>, vector<2x128xf32> -> vector<2x128xf32>
    %307 = arith.addf %304, %306 : vector<2x128xf32>
    %308 = vector.broadcast %133 : vector<1x128xf32> to vector<2x128xf32>
    %309 = arith.addf %307, %308 : vector<2x128xf32>
    %cst_92 = arith.constant dense<0.000000e+00> : vector<2x128xf32>
    %310 = tpu.matmul %301, %132, %cst_92 {dimension_numbers = #tpu.dot_dimension_numbers<[1], [0], [0], [1], [0, 0, 1, 1], [], []>} : vector<2x32xf32>, vector<32x128xf32>, vector<2x128xf32> -> vector<2x128xf32>
    %311 = arith.addf %305, %310 : vector<2x128xf32>
    %312 = vector.broadcast %134 : vector<1x128xf32> to vector<2x128xf32>
    %313 = arith.addf %311, %312 : vector<2x128xf32>
    %314 = arith.negf %309 : vector<2x128xf32>
    %315 = math.exp %314 : vector<2x128xf32>
    %cst_93 = arith.constant 1.000000e+00 : f32
    %316 = vector.broadcast %cst_93 : f32 to vector<2x128xf32>
    %317 = arith.addf %316, %315 : vector<2x128xf32>
    %318 = arith.divf %316, %317 : vector<2x128xf32>
    %319 = math.tanh %309 : vector<2x128xf32>
    %320 = vector.extract_strided_slice %318 {offsets = [0, 0], sizes = [2, 32], strides = [1, 1]} : vector<2x128xf32> to vector<2x32xf32>
    %321 = vector.extract_strided_slice %318 {offsets = [0, 32], sizes = [2, 32], strides = [1, 1]} : vector<2x128xf32> to vector<2x32xf32>
    %322 = vector.extract_strided_slice %319 {offsets = [0, 64], sizes = [2, 32], strides = [1, 1]} : vector<2x128xf32> to vector<2x32xf32>
    %323 = vector.extract_strided_slice %318 {offsets = [0, 96], sizes = [2, 32], strides = [1, 1]} : vector<2x128xf32> to vector<2x32xf32>
    %324 = arith.mulf %321, %284 : vector<2x32xf32>
    %325 = arith.mulf %320, %322 : vector<2x32xf32>
    %326 = arith.addf %324, %325 : vector<2x32xf32>
    %327 = math.tanh %326 : vector<2x32xf32>
    %328 = arith.mulf %323, %327 : vector<2x32xf32>
    %329 = arith.negf %313 : vector<2x128xf32>
    %330 = math.exp %329 : vector<2x128xf32>
    %cst_94 = arith.constant 1.000000e+00 : f32
    %331 = vector.broadcast %cst_94 : f32 to vector<2x128xf32>
    %332 = arith.addf %331, %330 : vector<2x128xf32>
    %333 = arith.divf %331, %332 : vector<2x128xf32>
    %334 = math.tanh %313 : vector<2x128xf32>
    %335 = vector.extract_strided_slice %333 {offsets = [0, 0], sizes = [2, 32], strides = [1, 1]} : vector<2x128xf32> to vector<2x32xf32>
    %336 = vector.extract_strided_slice %333 {offsets = [0, 32], sizes = [2, 32], strides = [1, 1]} : vector<2x128xf32> to vector<2x32xf32>
    %337 = vector.extract_strided_slice %334 {offsets = [0, 64], sizes = [2, 32], strides = [1, 1]} : vector<2x128xf32> to vector<2x32xf32>
    %338 = vector.extract_strided_slice %333 {offsets = [0, 96], sizes = [2, 32], strides = [1, 1]} : vector<2x128xf32> to vector<2x32xf32>
    %339 = arith.mulf %336, %299 : vector<2x32xf32>
    %340 = arith.mulf %335, %337 : vector<2x32xf32>
    %341 = arith.addf %339, %340 : vector<2x32xf32>
    %342 = math.tanh %341 : vector<2x32xf32>
    %343 = arith.mulf %338, %342 : vector<2x32xf32>
    %344 = arith.addf %302, %328 : vector<2x32xf32>
    %345 = arith.addf %303, %343 : vector<2x32xf32>
    %346 = vector.extract_strided_slice %130 {offsets = [10, 0], sizes = [2, 128], strides = [1, 1]} : vector<16x256xf32> to vector<2x128xf32>
    %347 = vector.extract_strided_slice %130 {offsets = [4, 128], sizes = [2, 128], strides = [1, 1]} : vector<16x256xf32> to vector<2x128xf32>
    %cst_95 = arith.constant dense<0.000000e+00> : vector<2x128xf32>
    %348 = tpu.matmul %328, %131, %cst_95 {dimension_numbers = #tpu.dot_dimension_numbers<[1], [0], [0], [1], [0, 0, 1, 1], [], []>} : vector<2x32xf32>, vector<32x128xf32>, vector<2x128xf32> -> vector<2x128xf32>
    %349 = arith.addf %346, %348 : vector<2x128xf32>
    %350 = vector.broadcast %133 : vector<1x128xf32> to vector<2x128xf32>
    %351 = arith.addf %349, %350 : vector<2x128xf32>
    %cst_96 = arith.constant dense<0.000000e+00> : vector<2x128xf32>
    %352 = tpu.matmul %343, %132, %cst_96 {dimension_numbers = #tpu.dot_dimension_numbers<[1], [0], [0], [1], [0, 0, 1, 1], [], []>} : vector<2x32xf32>, vector<32x128xf32>, vector<2x128xf32> -> vector<2x128xf32>
    %353 = arith.addf %347, %352 : vector<2x128xf32>
    %354 = vector.broadcast %134 : vector<1x128xf32> to vector<2x128xf32>
    %355 = arith.addf %353, %354 : vector<2x128xf32>
    %356 = arith.negf %351 : vector<2x128xf32>
    %357 = math.exp %356 : vector<2x128xf32>
    %cst_97 = arith.constant 1.000000e+00 : f32
    %358 = vector.broadcast %cst_97 : f32 to vector<2x128xf32>
    %359 = arith.addf %358, %357 : vector<2x128xf32>
    %360 = arith.divf %358, %359 : vector<2x128xf32>
    %361 = math.tanh %351 : vector<2x128xf32>
    %362 = vector.extract_strided_slice %360 {offsets = [0, 0], sizes = [2, 32], strides = [1, 1]} : vector<2x128xf32> to vector<2x32xf32>
    %363 = vector.extract_strided_slice %360 {offsets = [0, 32], sizes = [2, 32], strides = [1, 1]} : vector<2x128xf32> to vector<2x32xf32>
    %364 = vector.extract_strided_slice %361 {offsets = [0, 64], sizes = [2, 32], strides = [1, 1]} : vector<2x128xf32> to vector<2x32xf32>
    %365 = vector.extract_strided_slice %360 {offsets = [0, 96], sizes = [2, 32], strides = [1, 1]} : vector<2x128xf32> to vector<2x32xf32>
    %366 = arith.mulf %363, %326 : vector<2x32xf32>
    %367 = arith.mulf %362, %364 : vector<2x32xf32>
    %368 = arith.addf %366, %367 : vector<2x32xf32>
    %369 = math.tanh %368 : vector<2x32xf32>
    %370 = arith.mulf %365, %369 : vector<2x32xf32>
    %371 = arith.negf %355 : vector<2x128xf32>
    %372 = math.exp %371 : vector<2x128xf32>
    %cst_98 = arith.constant 1.000000e+00 : f32
    %373 = vector.broadcast %cst_98 : f32 to vector<2x128xf32>
    %374 = arith.addf %373, %372 : vector<2x128xf32>
    %375 = arith.divf %373, %374 : vector<2x128xf32>
    %376 = math.tanh %355 : vector<2x128xf32>
    %377 = vector.extract_strided_slice %375 {offsets = [0, 0], sizes = [2, 32], strides = [1, 1]} : vector<2x128xf32> to vector<2x32xf32>
    %378 = vector.extract_strided_slice %375 {offsets = [0, 32], sizes = [2, 32], strides = [1, 1]} : vector<2x128xf32> to vector<2x32xf32>
    %379 = vector.extract_strided_slice %376 {offsets = [0, 64], sizes = [2, 32], strides = [1, 1]} : vector<2x128xf32> to vector<2x32xf32>
    %380 = vector.extract_strided_slice %375 {offsets = [0, 96], sizes = [2, 32], strides = [1, 1]} : vector<2x128xf32> to vector<2x32xf32>
    %381 = arith.mulf %378, %341 : vector<2x32xf32>
    %382 = arith.mulf %377, %379 : vector<2x32xf32>
    %383 = arith.addf %381, %382 : vector<2x32xf32>
    %384 = math.tanh %383 : vector<2x32xf32>
    %385 = arith.mulf %380, %384 : vector<2x32xf32>
    %386 = arith.addf %344, %370 : vector<2x32xf32>
    %387 = arith.addf %345, %385 : vector<2x32xf32>
    %388 = vector.extract_strided_slice %130 {offsets = [12, 0], sizes = [2, 128], strides = [1, 1]} : vector<16x256xf32> to vector<2x128xf32>
    %389 = vector.extract_strided_slice %130 {offsets = [2, 128], sizes = [2, 128], strides = [1, 1]} : vector<16x256xf32> to vector<2x128xf32>
    %cst_99 = arith.constant dense<0.000000e+00> : vector<2x128xf32>
    %390 = tpu.matmul %370, %131, %cst_99 {dimension_numbers = #tpu.dot_dimension_numbers<[1], [0], [0], [1], [0, 0, 1, 1], [], []>} : vector<2x32xf32>, vector<32x128xf32>, vector<2x128xf32> -> vector<2x128xf32>
    %391 = arith.addf %388, %390 : vector<2x128xf32>
    %392 = vector.broadcast %133 : vector<1x128xf32> to vector<2x128xf32>
    %393 = arith.addf %391, %392 : vector<2x128xf32>
    %cst_100 = arith.constant dense<0.000000e+00> : vector<2x128xf32>
    %394 = tpu.matmul %385, %132, %cst_100 {dimension_numbers = #tpu.dot_dimension_numbers<[1], [0], [0], [1], [0, 0, 1, 1], [], []>} : vector<2x32xf32>, vector<32x128xf32>, vector<2x128xf32> -> vector<2x128xf32>
    %395 = arith.addf %389, %394 : vector<2x128xf32>
    %396 = vector.broadcast %134 : vector<1x128xf32> to vector<2x128xf32>
    %397 = arith.addf %395, %396 : vector<2x128xf32>
    %398 = arith.negf %393 : vector<2x128xf32>
    %399 = math.exp %398 : vector<2x128xf32>
    %cst_101 = arith.constant 1.000000e+00 : f32
    %400 = vector.broadcast %cst_101 : f32 to vector<2x128xf32>
    %401 = arith.addf %400, %399 : vector<2x128xf32>
    %402 = arith.divf %400, %401 : vector<2x128xf32>
    %403 = math.tanh %393 : vector<2x128xf32>
    %404 = vector.extract_strided_slice %402 {offsets = [0, 0], sizes = [2, 32], strides = [1, 1]} : vector<2x128xf32> to vector<2x32xf32>
    %405 = vector.extract_strided_slice %402 {offsets = [0, 32], sizes = [2, 32], strides = [1, 1]} : vector<2x128xf32> to vector<2x32xf32>
    %406 = vector.extract_strided_slice %403 {offsets = [0, 64], sizes = [2, 32], strides = [1, 1]} : vector<2x128xf32> to vector<2x32xf32>
    %407 = vector.extract_strided_slice %402 {offsets = [0, 96], sizes = [2, 32], strides = [1, 1]} : vector<2x128xf32> to vector<2x32xf32>
    %408 = arith.mulf %405, %368 : vector<2x32xf32>
    %409 = arith.mulf %404, %406 : vector<2x32xf32>
    %410 = arith.addf %408, %409 : vector<2x32xf32>
    %411 = math.tanh %410 : vector<2x32xf32>
    %412 = arith.mulf %407, %411 : vector<2x32xf32>
    %413 = arith.negf %397 : vector<2x128xf32>
    %414 = math.exp %413 : vector<2x128xf32>
    %cst_102 = arith.constant 1.000000e+00 : f32
    %415 = vector.broadcast %cst_102 : f32 to vector<2x128xf32>
    %416 = arith.addf %415, %414 : vector<2x128xf32>
    %417 = arith.divf %415, %416 : vector<2x128xf32>
    %418 = math.tanh %397 : vector<2x128xf32>
    %419 = vector.extract_strided_slice %417 {offsets = [0, 0], sizes = [2, 32], strides = [1, 1]} : vector<2x128xf32> to vector<2x32xf32>
    %420 = vector.extract_strided_slice %417 {offsets = [0, 32], sizes = [2, 32], strides = [1, 1]} : vector<2x128xf32> to vector<2x32xf32>
    %421 = vector.extract_strided_slice %418 {offsets = [0, 64], sizes = [2, 32], strides = [1, 1]} : vector<2x128xf32> to vector<2x32xf32>
    %422 = vector.extract_strided_slice %417 {offsets = [0, 96], sizes = [2, 32], strides = [1, 1]} : vector<2x128xf32> to vector<2x32xf32>
    %423 = arith.mulf %420, %383 : vector<2x32xf32>
    %424 = arith.mulf %419, %421 : vector<2x32xf32>
    %425 = arith.addf %423, %424 : vector<2x32xf32>
    %426 = math.tanh %425 : vector<2x32xf32>
    %427 = arith.mulf %422, %426 : vector<2x32xf32>
    %428 = arith.addf %386, %412 : vector<2x32xf32>
    %429 = arith.addf %387, %427 : vector<2x32xf32>
    %430 = vector.extract_strided_slice %130 {offsets = [14, 0], sizes = [2, 128], strides = [1, 1]} : vector<16x256xf32> to vector<2x128xf32>
    %431 = vector.extract_strided_slice %130 {offsets = [0, 128], sizes = [2, 128], strides = [1, 1]} : vector<16x256xf32> to vector<2x128xf32>
    %cst_103 = arith.constant dense<0.000000e+00> : vector<2x128xf32>
    %432 = tpu.matmul %412, %131, %cst_103 {dimension_numbers = #tpu.dot_dimension_numbers<[1], [0], [0], [1], [0, 0, 1, 1], [], []>} : vector<2x32xf32>, vector<32x128xf32>, vector<2x128xf32> -> vector<2x128xf32>
    %433 = arith.addf %430, %432 : vector<2x128xf32>
    %434 = vector.broadcast %133 : vector<1x128xf32> to vector<2x128xf32>
    %435 = arith.addf %433, %434 : vector<2x128xf32>
    %cst_104 = arith.constant dense<0.000000e+00> : vector<2x128xf32>
    %436 = tpu.matmul %427, %132, %cst_104 {dimension_numbers = #tpu.dot_dimension_numbers<[1], [0], [0], [1], [0, 0, 1, 1], [], []>} : vector<2x32xf32>, vector<32x128xf32>, vector<2x128xf32> -> vector<2x128xf32>
    %437 = arith.addf %431, %436 : vector<2x128xf32>
    %438 = vector.broadcast %134 : vector<1x128xf32> to vector<2x128xf32>
    %439 = arith.addf %437, %438 : vector<2x128xf32>
    %440 = arith.negf %435 : vector<2x128xf32>
    %441 = math.exp %440 : vector<2x128xf32>
    %cst_105 = arith.constant 1.000000e+00 : f32
    %442 = vector.broadcast %cst_105 : f32 to vector<2x128xf32>
    %443 = arith.addf %442, %441 : vector<2x128xf32>
    %444 = arith.divf %442, %443 : vector<2x128xf32>
    %445 = math.tanh %435 : vector<2x128xf32>
    %446 = vector.extract_strided_slice %444 {offsets = [0, 0], sizes = [2, 32], strides = [1, 1]} : vector<2x128xf32> to vector<2x32xf32>
    %447 = vector.extract_strided_slice %444 {offsets = [0, 32], sizes = [2, 32], strides = [1, 1]} : vector<2x128xf32> to vector<2x32xf32>
    %448 = vector.extract_strided_slice %445 {offsets = [0, 64], sizes = [2, 32], strides = [1, 1]} : vector<2x128xf32> to vector<2x32xf32>
    %449 = vector.extract_strided_slice %444 {offsets = [0, 96], sizes = [2, 32], strides = [1, 1]} : vector<2x128xf32> to vector<2x32xf32>
    %450 = arith.mulf %447, %410 : vector<2x32xf32>
    %451 = arith.mulf %446, %448 : vector<2x32xf32>
    %452 = arith.addf %450, %451 : vector<2x32xf32>
    %453 = math.tanh %452 : vector<2x32xf32>
    %454 = arith.mulf %449, %453 : vector<2x32xf32>
    %455 = arith.negf %439 : vector<2x128xf32>
    %456 = math.exp %455 : vector<2x128xf32>
    %cst_106 = arith.constant 1.000000e+00 : f32
    %457 = vector.broadcast %cst_106 : f32 to vector<2x128xf32>
    %458 = arith.addf %457, %456 : vector<2x128xf32>
    %459 = arith.divf %457, %458 : vector<2x128xf32>
    %460 = math.tanh %439 : vector<2x128xf32>
    %461 = vector.extract_strided_slice %459 {offsets = [0, 0], sizes = [2, 32], strides = [1, 1]} : vector<2x128xf32> to vector<2x32xf32>
    %462 = vector.extract_strided_slice %459 {offsets = [0, 32], sizes = [2, 32], strides = [1, 1]} : vector<2x128xf32> to vector<2x32xf32>
    %463 = vector.extract_strided_slice %460 {offsets = [0, 64], sizes = [2, 32], strides = [1, 1]} : vector<2x128xf32> to vector<2x32xf32>
    %464 = vector.extract_strided_slice %459 {offsets = [0, 96], sizes = [2, 32], strides = [1, 1]} : vector<2x128xf32> to vector<2x32xf32>
    %465 = arith.mulf %462, %425 : vector<2x32xf32>
    %466 = arith.mulf %461, %463 : vector<2x32xf32>
    %467 = arith.addf %465, %466 : vector<2x32xf32>
    %468 = math.tanh %467 : vector<2x32xf32>
    %469 = arith.mulf %464, %468 : vector<2x32xf32>
    %470 = arith.addf %428, %454 : vector<2x32xf32>
    %471 = arith.addf %429, %469 : vector<2x32xf32>
    %472 = tpu.concatenate %470, %471 in 1 : vector<2x32xf32>, vector<2x32xf32> -> vector<2x64xf32>
    %473 = vector.extract_strided_slice %454 {offsets = [0, 0], sizes = [1, 32], strides = [1, 1]} : vector<2x32xf32> to vector<1x32xf32>
    %474 = vector.extract_strided_slice %454 {offsets = [1, 0], sizes = [1, 32], strides = [1, 1]} : vector<2x32xf32> to vector<1x32xf32>
    %475 = vector.extract_strided_slice %469 {offsets = [0, 0], sizes = [1, 32], strides = [1, 1]} : vector<2x32xf32> to vector<1x32xf32>
    %476 = vector.extract_strided_slice %469 {offsets = [1, 0], sizes = [1, 32], strides = [1, 1]} : vector<2x32xf32> to vector<1x32xf32>
    %477 = tpu.concatenate %473, %474 in 1 : vector<1x32xf32>, vector<1x32xf32> -> vector<1x64xf32>
    %478 = tpu.concatenate %475, %476 in 1 : vector<1x32xf32>, vector<1x32xf32> -> vector<1x64xf32>
    %479 = tpu.concatenate %477, %478 in 0 : vector<1x64xf32>, vector<1x64xf32> -> vector<2x64xf32>
    %480 = arith.addf %472, %479 : vector<2x64xf32>
    %481 = tpu.concatenate %480, %128 in 1 : vector<2x64xf32>, vector<2x32xf32> -> vector<2x96xf32>
    %c0_107 = arith.constant 0 : index
    %c0_108 = arith.constant 0 : index
    %482 = vector.load %arg23[%c0_107, %c0_108] : memref<96x5xf32, #tpu.memory_space<vmem>>, vector<96x5xf32>
    %cst_109 = arith.constant dense<0.000000e+00> : vector<2x5xf32>
    %483 = tpu.matmul %481, %482, %cst_109 {dimension_numbers = #tpu.dot_dimension_numbers<[1], [0], [0], [1], [0, 0, 1, 1], [], []>} : vector<2x96xf32>, vector<96x5xf32>, vector<2x5xf32> -> vector<2x5xf32>
    %c0_110 = arith.constant 0 : index
    %c0_111 = arith.constant 0 : index
    %484 = vector.load %arg24[%c0_110, %c0_111] : memref<1x5xf32, #tpu.memory_space<vmem>>, vector<1x5xf32>
    %485 = vector.broadcast %484 : vector<1x5xf32> to vector<2x5xf32>
    %486 = arith.addf %483, %485 : vector<2x5xf32>
    %cst_112 = arith.constant 0.000000e+00 : f32
    %487 = vector.broadcast %cst_112 : f32 to vector<2x27xf32>
    %488 = tpu.concatenate %481, %486, %487 in 1 : vector<2x96xf32>, vector<2x5xf32>, vector<2x27xf32> -> vector<2x128xf32>
    %c0_113 = arith.constant 0 : index
    %c0_114 = arith.constant 0 : index
    %489 = vector.load %arg25[%c0_113, %c0_114] : memref<2x128xf32, #tpu.memory_space<vmem>>, vector<2x128xf32>
    tpu.vector_store %arg25[%c0_113, %c0_114], %488 {strides = array<i32>} : memref<2x128xf32, #tpu.memory_space<vmem>>, vector<2x128xf32>,
    return
  }
}

</mosaic_0001>

<bundles_post_ra>
// kernel: forward.1
= control target key start
LH: loop header
LB: loop body
LE: loop exit
PB: predicated region body
PF: predicated region fallthrough
CT: control target
= control target key end

     0   :  { %vm86_vm0 = vcmask 261120   ;;  %v2124_v4 = vmov 32.0   ;;  %vm230_vm8 = vcmask 130048   ;;  %s2877_s0 = inlined_call_operand.vmem [shape: f32[16,32], index: 0, kind: input, shape index: {}]   ;;  %s2878_s2 = inlined_call_operand.vmem [shape: f32[1,32], index: 2, kind: input, shape index: {}]   ;;  %s2879_s3 = inlined_call_operand.vmem [shape: f32[1,32], index: 3, kind: input, shape index: {}]   ;;  %s2880_s5 = inlined_call_operand.vmem [shape: f32[1,96], index: 5, kind: input, shape index: {}]   ;;  %s2881_s4 = inlined_call_operand.vmem [shape: f32[32,96], index: 4, kind: input, shape index: {}]   ;;  %s2882_s1 = inlined_call_operand.vmem [shape: f32[16,16], index: 1, kind: input, shape index: {}]   ;;  %s2883_s6 = inlined_call_operand.vmem [shape: f32[32,32], index: 6, kind: input, shape index: {}]   ;;  %s2884_s7 = inlined_call_operand.vmem [shape: f32[1,32], index: 7, kind: input, shape index: {}]   ;;  %s2885_s8 = inlined_call_operand.vmem [shape: f32[1,32], index: 8, kind: input, shape index: {}]   ;;  %s2886_s9 = inlined_call_operand.vmem [shape: f32[1,32], index: 9, kind: input, shape index: {}]   ;;  %s2887_s11 = inlined_call_operand.vmem [shape: f32[1,64], index: 11, kind: input, shape index: {}]   ;;  %s2888_s10 = inlined_call_operand.vmem [shape: f32[32,64], index: 10, kind: input, shape index: {}]   ;;  %s2889_s12 = inlined_call_operand.vmem [shape: f32[64,32], index: 12, kind: input, shape index: {}]   ;;  %s2890_s13 = inlined_call_operand.vmem [shape: f32[1,32], index: 13, kind: input, shape index: {}]   ;;  %s2891_s14 = inlined_call_operand.vmem [shape: f32[1,32], index: 14, kind: input, shape index: {}]   ;;  %s2892_s15 = inlined_call_operand.vmem [shape: f32[1,32], index: 15, kind: input, shape index: {}]   ;;  %s2893_s16 = inlined_call_operand.vmem [shape: f32[32,32], index: 16, kind: input, shape index: {}]   ;;  %s2894_s18 = inlined_call_operand.vmem [shape: f32[32,256], index: 18, kind: input, shape index: {}]   ;;  %s2895_s19 = inlined_call_operand.vmem [shape: f32[32,128], index: 19, kind: input, shape index: {}]   ;;  %s2896_s20 = inlined_call_operand.vmem [shape: f32[32,128], index: 20, kind: input, shape index: {}]   ;;  %s2897_s17 = inlined_call_operand.vmem [shape: f32[1,32], index: 17, kind: input, shape index: {}]   ;;  %s2898_s22 = inlined_call_operand.vmem [shape: f32[1,128], index: 22, kind: input, shape index: {}]   ;;  %s2899_s21 = inlined_call_operand.vmem [shape: f32[1,128], index: 21, kind: input, shape index: {}]   ;;  %s2900_s24 = inlined_call_operand.vmem [shape: f32[1,5], index: 24, kind: input, shape index: {}]   ;;  %s2901_s23 = inlined_call_operand.vmem [shape: f32[96,5], index: 23, kind: input, shape index: {}]   ;;  %s2902_s25 = inlined_call_operand.vmem [shape: f32[2,128], index: 25, kind: output, shape index: {}]  }
   0x1   :  { %2907 = sst [smem:[#allocation2_spill]] %s2877_s0  ;;  %1970 = vrcp.f32 %v2124_v4  ;;  %s2126_s0 = smov 64  }
   0x2   :  { %2908 = sst [smem:[#allocation3_spill]] %s2878_s2 }
   0x3   :  { %2909 = sst [smem:[#allocation4_spill]] %s2879_s3 }
   0x4   :  { %2910 = sst [smem:[#allocation5_spill]] %s2880_s5 }
   0x5   :  { %2911 = sst [smem:[#allocation6_spill]] %s2881_s4 }
   0x6   :  { %2912 = sst [smem:[#allocation7_spill]] %s2882_s1 }
   0x7   :  { %2913 = sst [smem:[#allocation8_spill]] %s2883_s6  ;;  %v1971_v5 = vpop.eup %1970 }
   0x8   :  { %2914 = sst [smem:[#allocation9_spill]] %s2884_s7  ;;  %v94_v6 = vmul.f32 32.0, %v1971_v5  ;;  %vm98_vm1 = vweird.f32 %v1971_v5 }
   0x9   :  { %2915 = sst [smem:[#allocation10_spill]] %s2885_s8  ;;  %s2125_s8 = smov 96  }
   0xa   :  { %2916 = sst [smem:[#allocation11_spill]] %s2886_s9  ;;  %v95_v7 = vsub.f32 1.0, %v94_v6 }
   0xb   :  { %s2917_s6 = sld [smem:[#allocation2_spill]] }
   0xc   :  { %v96_v8 = vmul.f32 %v1971_v5, %v95_v7  ;;  %s2918_s2 = sld [smem:[#allocation6_spill]] }
   0xd   :  { %s2919_s3 = sld [smem:[#allocation3_spill]] }
   0xe   :  { %v97_v9 = vadd.f32 %v1971_v5, %v96_v8  ;;  %s2920_s7 = sld [smem:[#allocation4_spill]] }
   0xf   :  { %s2922_s28 = sld [smem:[#allocation7_spill]] }
  0x10   :  { %v2267_v10 = vsel %vm98_vm1, %v1971_v5, %v97_v9  ;;  %s2924_s9 = sld [smem:[#allocation9_spill]] }
  0x11   :  { %v80_v0 = vld [vmem:[%s2917_s6] sm:$0xff]  ;;  %v81_v2 = vld [vmem:[%s2917_s6 + $0x8] sm:$0xff]  ;;  %s2923_s6 = sld [smem:[#allocation8_spill]] }
  0x12   :  { %v87_v1 = vsel %vm86_vm0, %v80_v0, 0.0  ;;  %v90_v3 = vsel %vm86_vm0, %v81_v2, 0.0  ;;  %v151_v21 = vld [vmem:[%s2918_s2 + $0x18] sm:$0xff]  ;;  %v150_v22 = vld [vmem:[%s2918_s2 + $0x10] sm:$0xff]  ;;  %v149_v23 = vld [vmem:[%s2918_s2 + $0x8] sm:$0xff]  ;;  %s2925_s5 = sld [smem:[#allocation10_spill]] }
  0x13   :  { %88 = vadd.xlane.f32.xlu0 %v87_v1  ;;  %174 = vmatpush.msra.mxu1 %v151_v21  ;;  %v148_v24 = vld [vmem:[%s2918_s2] sm:$0xff]  ;;  %s2921_s2 = sld [smem:[#allocation5_spill]] }
  0x14   :  { %v1956_v39 = vld [vmem:[%s2919_s3] ss:$0 sm:$0xff]  ;;  %s2926_s27 = sld [smem:[#allocation11_spill]] }
  0x15   :  { %175 = vmatpush.msra.mxu1 %v150_v22  ;;  %v1957_v43 = vld [vmem:[%s2920_s7] ss:$0 sm:$0xff] }
  0x16   :  { %v82_v60 = vld [vmem:[%s2922_s28] sm:$0xff] }
  0x17   :  { %176 = vmatpush.msra.mxu1 %v149_v23  ;;  %v224_v61 = vsub.f32 1.0, %v82_v60 }
  0x19   :  { %177 = vmatpush.msra.mxu1 %v148_v24  ;;  %v1958_v54 = vld [vmem:[%s2921_s2] ss:$0 sm:$0xff]  ;;  %v226_v62 = vmul.f32 -1e+09, %v224_v61 }
  0x1b   :  { %91 = vadd.xlane.f32.xlu0 %v90_v3 }
  0x86   :  { %v89_v11 = vpop.xlane.xlu0 %88 }
  0x87   :  { %v100_v12 = vmul.f32 %v2267_v10, %v89_v11 }
  0x89   :  { %v102_v13 = vsub.f32 %v80_v0, %v100_v12  ;;  %v83_v0 = vld [vmem:[%s2922_s28 + $0x8] sm:$0xff]  ;;  %s2128_s28 = smov 32  }
  0x8a   :  { %v225_v3 = vsub.f32 1.0, %v83_v0 }
  0x8b   :  { %v104_v14 = vmul.f32 %v102_v13, %v102_v13 }
  0x8c   :  { %v227_v5 = vmul.f32 -1e+09, %v225_v3 }
  0x8d   :  { %v106_v15 = vsel %vm86_vm0, %v104_v14, 0.0 }
  0x8e   :  { %107 = vadd.xlane.f32.xlu1 %v106_v15  ;;  %v92_v16 = vpop.xlane.xlu0 %91 }
  0x8f   :  { %v101_v17 = vmul.f32 %v2267_v10, %v92_v16 }
  0x91   :  { %v103_v18 = vsub.f32 %v81_v2, %v101_v17 }
  0x93   :  { %v105_v19 = vmul.f32 %v103_v18, %v103_v18 }
  0x95   :  { %v109_v20 = vsel %vm86_vm0, %v105_v19, 0.0 }
  0x96   :  { %110 = vadd.xlane.f32.xlu1 %v109_v20 }
 0x101   :  { %v108_v25 = vpop.xlane.xlu1 %107 }
 0x102   :  { %v112_v26 = vmul.f32 %v108_v25, %v2267_v10  ;;  %v317_v25 = vld [vmem:[%s2923_s6 + $0x18] sm:$0xff] }
 0x103   :  { %340 = vmatpush.msra.mxu3 %v317_v25 }
 0x104   :  { %v114_v27 = vadd.f32 1e-12, %v112_v26  ;;  %v316_v26 = vld [vmem:[%s2923_s6 + $0x10] sm:$0xff] }
 0x105   :  { %341 = vmatpush.msra.mxu3 %v316_v26  ;;  %v451_v26 = vld [vmem:[%s2889_s12 + $0x18] sm:$0xff] }
 0x106   :  { %1972 = vrsqrt.f32 %v114_v27  ;;  %vm122_vm3 = vweird.f32 %v114_v27 }
 0x109   :  { %v111_v28 = vpop.xlane.xlu1 %110 }
 0x10a   :  { %v113_v29 = vmul.f32 %v111_v28, %v2267_v10 }
 0x10c   :  { %v1973_v30 = vpop.eup %1972  ;;  %v115_v31 = vadd.f32 1e-12, %v113_v29 }
 0x10d   :  { %v117_v32 = vmul.f32 %v1973_v30, %v114_v27  ;;  %vm123_vm2 = vweird.f32 %v1973_v30  ;;  %v315_v27 = vld [vmem:[%s2923_s6 + $0x8] sm:$0xff] }
 0x10e   :  { %1974 = vrsqrt.f32 %v115_v31  ;;  %vm124_vm4 = vmor %vm122_vm3, %vm123_vm2  ;;  %vm132_vm6 = vweird.f32 %v115_v31  ;;  %342 = vmatpush.msra.mxu3 %v315_v27 }
 0x10f   :  { %v118_v33 = vmul.f32 %v1973_v30, %v117_v32 }
 0x111   :  { %v119_v34 = vmul.f32 0.5, %v118_v33 }
 0x113   :  { %v120_v35 = vsub.f32 1.5, %v119_v34 }
 0x114   :  { %v1975_v36 = vpop.eup %1974 }
 0x115   :  { %v121_v37 = vmul.f32 %v1973_v30, %v120_v35  ;;  %v127_v38 = vmul.f32 %v1975_v36, %v115_v31  ;;  %vm133_vm5 = vweird.f32 %v1975_v36 }
 0x116   :  { %vm134_vm7 = vmor %vm132_vm6, %vm133_vm5 }
 0x117   :  { %v125_v40 = vsel %vm124_vm4, %v1973_v30, %v121_v37  ;;  %v128_v41 = vmul.f32 %v1975_v36, %v127_v38 }
 0x118   :  { %v136_v42 = vmul.f32 %v125_v40, %v102_v13 }
 0x119   :  { %v129_v44 = vmul.f32 0.5, %v128_v41 }
 0x11a   :  { %v141_v45 = vmul.f32 %v1956_v39, %v136_v42 }
 0x11b   :  { %v130_v46 = vsub.f32 1.5, %v129_v44 }
 0x11c   :  { %v2293_v47 = vadd.f32 %v1957_v43, %v141_v45 }
 0x11d   :  { %v131_v48 = vmul.f32 %v1975_v36, %v130_v46 }
 0x11e   :  { %1888 = vmatmul.msk.f32.vlgmr.msra.gmra.mxu1 %vm86_vm0, %v2293_v47 }
 0x11f   :  { %v135_v49 = vsel %vm134_vm7, %v1975_v36, %v131_v48 }
 0x120   :  { %v137_v50 = vmul.f32 %v135_v49, %v103_v18 }
 0x122   :  { %v142_v51 = vmul.f32 %v1956_v39, %v137_v50 }
 0x124   :  { %v2297_v52 = vadd.f32 %v1957_v43, %v142_v51 }
 0x126   :  { %1889 = vmatmul.msk.f32.gmra.mxu1 %vm86_vm0, %v2297_v52 }
 0x19b   :  { %v179_v53 = vpop.f32.mrf.mxu1 }
 0x19c   :  { %v180_v57 = vadd.f32 %v1958_v54, %v179_v53 }
 0x1a3   :  { %v182_v55 = vpop.f32.mrf.mxu1 }
 0x1a4   :  { %v183_v56 = vadd.f32 %v1958_v54, %v182_v55  ;;  %v314_v54 = vld [vmem:[%s2923_s6] sm:$0xff] }
 0x1a5   :  { %343 = vmatpush.msra.mxu3 %v314_v54 }
 0x1a6   :  { %189 = vrot.lane.b32.xlu2 %v183_v56, %s2125_s8  ;;  %v1951_v11 = vpack.i.bf16 %v180_v57, %v183_v56 }
 0x1ae   :  { %187 = vrot.lane.b32.xlu2 %v180_v57, %s2125_s8 }
 0x200   :  { %v190_v58 = vpop.permute.xlu2 %189 }
 0x201   :  { %1890 = vmatpush.xpose.msk.msrb.mxu1 %vm86_vm0, %v190_v58 }
 0x208   :  { %v188_v59 = vpop.permute.xlu2 %187 }
 0x209   :  { %1891 = vmatpush.xpose.msk.msrb.mxu1 %vm86_vm0, %v188_v59 }
 0x20c   :  { %1892 = vmatmul.msk.f32.vlgmr.msrb.gmra.mxu1 %vm86_vm0, %v180_v57  ;;  %v1959_v57 = vld [vmem:[%s2924_s9] ss:$0 sm:$0xff] }
 0x214   :  { %1893 = vmatmul.msk.f32.gmra.mxu1 %vm86_vm0, %v183_v56 }
 0x289   :  { %v216_v63 = vpop.f32.mrf.mxu1 }
 0x28a   :  { %v222_v1 = vmul.f32 0.17677669, %v216_v63 }
 0x28c   :  { %v228_v2 = vadd.f32 %v226_v62, %v222_v1 }
 0x28e   :  { %v231_v4 = vsel %vm230_vm8, %v228_v2, -inf }
 0x28f   :  { %232 = vmax.xlane.f32.xlu0 %v231_v4 }
 0x291   :  { %v219_v6 = vpop.f32.mrf.mxu1 }
 0x292   :  { %v223_v7 = vmul.f32 0.17677669, %v219_v6 }
 0x294   :  { %v229_v8 = vadd.f32 %v227_v5, %v223_v7 }
 0x296   :  { %v234_v9 = vsel %vm230_vm8, %v229_v8, -inf }
 0x297   :  { %235 = vmax.xlane.f32.xlu1 %v234_v9 }
 0x2b0   :  { %1952 = vrot.lane.b32.xlu1 %v1951_v11, %s2126_s0  ;;  %v412_v11 = vld [vmem:[%s2888_s10 + $0x18] sm:$0xff] }
 0x302   :  { %v233_v12 = vpop.xlane.xlu0 %232 }
 0x303   :  { %v237_v13 = vsub.f32 %v228_v2, %v233_v12  ;;  %v411_v12 = vld [vmem:[%s2888_s10 + $0x10] sm:$0xff] }
 0x305   :  { %v239_v14 = vmul.f32 1.442695, %v237_v13  ;;  %v410_v13 = vld [vmem:[%s2888_s10 + $0x8] sm:$0xff] }
 0x307   :  { %1976 = vpow2.f32 %v239_v14  ;;  %v409_v14 = vld [vmem:[%s2888_s10] sm:$0xff] }
 0x30a   :  { %v236_v15 = vpop.xlane.xlu1 %235 }
 0x30b   :  { %v238_v16 = vsub.f32 %v229_v8, %v236_v15 }
 0x30d   :  { %v1977_v17 = vpop.eup %1976  ;;  %v241_v18 = vmul.f32 1.442695, %v238_v16 }
 0x30e   :  { %v243_v19 = vsel %vm230_vm8, %v1977_v17, 0.0 }
 0x30f   :  { %1978 = vpow2.f32 %v241_v18  ;;  %244 = vadd.xlane.f32.xlu2 %v243_v19  ;;  %v455_v18 = vld [vmem:[%s2889_s12 + $0x38] sm:$0xff]  ;;  %v454_v19 = vld [vmem:[%s2889_s12 + $0x30] sm:$0xff] }
 0x310   :  { %475 = vmatpush.msra.mxu0 %v455_v18  ;;  %1938 = vmatpush.msrb.mxu3 %v455_v18  ;;  %v584_v18 = vld [vmem:[%s2894_s18 + $0x20] sm:$0xff] }
 0x312   :  { %476 = vmatpush.msra.mxu0 %v454_v19  ;;  %1939 = vmatpush.msrb.mxu3 %v454_v19  ;;  %v585_v19 = vld [vmem:[%s2894_s18 + $0x28] sm:$0xff] }
 0x315   :  { %v1979_v20 = vpop.eup %1978 }
 0x316   :  { %v246_v21 = vsel %vm230_vm8, %v1979_v20, 0.0 }
 0x317   :  { %247 = vadd.xlane.f32.xlu0 %v246_v21 }
 0x322   :  { %v1953_v22 = vpop.permute.xlu1 %1952 }
 0x323   :  { %v1954_v23 = vunpack.i.l.bf16 %v1953_v22  ;;  %v1955_v24 = vunpack.i.h.bf16 %v1953_v22 }
 0x325   :  { %305 = vmatpush.msra.mxu2 %v1954_v23  ;;  %v452_v23 = vld [vmem:[%s2889_s12 + $0x20] sm:$0xff] }
 0x327   :  { %306 = vmatpush.msra.mxu2 %v1955_v24 }
 0x329   :  { %435 = vmatpush.msrb.mxu2 %v412_v11 }
 0x32b   :  { %436 = vmatpush.msrb.mxu2 %v411_v12 }
 0x32d   :  { %437 = vmatpush.msrb.mxu2 %v410_v13 }
 0x32f   :  { %438 = vmatpush.msrb.mxu2 %v409_v14  ;;  %v551_v14 = vld [vmem:[%s2893_s16 + $0x18] sm:$0xff] }
 0x382   :  { %v245_v28 = vpop.xlane.xlu2 %244 }
 0x383   :  { %1980 = vrcp.f32 %v245_v28  ;;  %v260_v33 = vand.u32 2147483648, %v245_v28  ;;  %v258_v35 = vand.u32 2147483647, %v245_v28  ;;  %vm254_vm10 = vweird.f32 %v245_v28 }
 0x385   :  { %v261_v38 = vor.u32 1.1754944e-38, %v260_v33  ;;  %vm259_vm12 = vcmp.eq.f32.partialorder %v258_v35, 8.507059e+37 }
 0x389   :  { %v1981_v29 = vpop.eup %1980 }
 0x38a   :  { %v250_v30 = vmul.f32 %v1981_v29, %v245_v28  ;;  %v248_v31 = vpop.xlane.xlu0 %247  ;;  %vm255_vm9 = vweird.f32 %v1981_v29 }
 0x38b   :  { %1982 = vrcp.f32 %v248_v31  ;;  %vm256_vm11 = vmor %vm254_vm10, %vm255_vm9  ;;  %v275_v44 = vand.u32 2147483648, %v248_v31  ;;  %v273_v46 = vand.u32 2147483647, %v248_v31  ;;  %vm269_vm14 = vweird.f32 %v248_v31 }
 0x38c   :  { %v251_v32 = vsub.f32 1.0, %v250_v30 }
 0x38d   :  { %v276_v49 = vor.u32 1.1754944e-38, %v275_v44  ;;  %vm274_vm1 = vcmp.eq.f32.partialorder %v273_v46, 8.507059e+37 }
 0x38e   :  { %v252_v34 = vmul.f32 %v1981_v29, %v251_v32 }
 0x390   :  { %v253_v36 = vadd.f32 %v1981_v29, %v252_v34  ;;  %v1960_v34 = vld [vmem:[%s2925_s5] ss:$0 sm:$0xff] }
 0x391   :  { %v1983_v37 = vpop.eup %1982 }
 0x392   :  { %v265_v39 = vmul.f32 %v1983_v37, %v248_v31  ;;  %v257_v40 = vsel %vm256_vm11, %v1981_v29, %v253_v36  ;;  %vm270_vm13 = vweird.f32 %v1983_v37 }
 0x393   :  { %v262_v41 = vsel %vm259_vm12, %v261_v38, %v257_v40  ;;  %vm271_vm15 = vmor %vm269_vm14, %vm270_vm13  ;;  %v1961_v38 = vld [vmem:[%s2926_s27] ss:$0 sm:$0xff] }
 0x394   :  { %v266_v42 = vsub.f32 1.0, %v265_v39  ;;  %v263_v43 = vmul.f32 %v1977_v17, %v262_v41 }
 0x396   :  { %v267_v45 = vmul.f32 %v1983_v37, %v266_v42  ;;  %1894 = vmatmul.msk.f32.vlgmr.msra.gmra.mxu2 %vm230_vm8, %v263_v43 }
 0x397   :  { %571 = vmatpush.msra.mxu2 %v551_v14 }
 0x398   :  { %v268_v48 = vadd.f32 %v1983_v37, %v267_v45 }
 0x39a   :  { %v272_v50 = vsel %vm271_vm15, %v1983_v37, %v268_v48 }
 0x39b   :  { %v277_v51 = vsel %vm274_vm1, %v276_v49, %v272_v50  ;;  %v450_v49 = vld [vmem:[%s2889_s12 + $0x10] sm:$0xff]  ;;  %v449_v50 = vld [vmem:[%s2889_s12 + $0x8] sm:$0xff] }
 0x39c   :  { %v278_v53 = vmul.f32 %v1979_v20, %v277_v51  ;;  %v453_v20 = vld [vmem:[%s2889_s12 + $0x28] sm:$0xff]  ;;  %v448_v51 = vld [vmem:[%s2889_s12] sm:$0xff] }
 0x39d   :  { %477 = vmatpush.msra.mxu0 %v453_v20  ;;  %1940 = vmatpush.msrb.mxu3 %v453_v20  ;;  %v549_v20 = vld [vmem:[%s2893_s16 + $0x8] sm:$0xff] }
 0x39e   :  { %1895 = vmatmul.msk.f32.gmra.mxu2 %vm230_vm8, %v278_v53  ;;  %v1962_v53 = vld [vmem:[%s2887_s11] ss:$0 sm:$0xff]  ;;  %vm460_vm8 = vcmask 523264  }
 0x39f   :  { %478 = vmatpush.msra.mxu0 %v452_v23  ;;  %1941 = vmatpush.msrb.mxu3 %v452_v23  ;;  %v548_v23 = vld [vmem:[%s2893_s16] sm:$0xff] }
 0x3a1   :  { %479 = vmatpush.msra.mxu0 %v451_v26  ;;  %1942 = vmatpush.msrb.mxu3 %v451_v26  ;;  %v2460_v26 = vld [vmem:[%s2895_s19 + $0x18] sm:$0xff] }
 0x3a3   :  { %480 = vmatpush.msra.mxu0 %v450_v49  ;;  %1943 = vmatpush.msrb.mxu3 %v450_v49 }
 0x3a5   :  { %481 = vmatpush.msra.mxu0 %v449_v50  ;;  %1944 = vmatpush.msrb.mxu3 %v449_v50  ;;  %v1965_v50 = vld [vmem:[%s2892_s15] ss:$0 sm:$0xff] }
 0x3a7   :  { %482 = vmatpush.msra.mxu0 %v448_v51  ;;  %1945 = vmatpush.msrb.mxu3 %v448_v51 }
 0x419   :  { %v308_v55 = vpop.f32.mrf.mxu2 }
 0x41a   :  { %1896 = vmatmul.msk.f32.vlgmr.msra.gmra.mxu3 %vm86_vm0, %v308_v55 }
 0x421   :  { %v311_v56 = vpop.f32.mrf.mxu2 }
 0x422   :  { %1897 = vmatmul.msk.f32.gmra.mxu3 %vm86_vm0, %v311_v56 }
 0x49d   :  { %v345_v58 = vpop.f32.mrf.mxu3 }
 0x49e   :  { %v346_v59 = vadd.f32 %v1959_v57, %v345_v58 }
 0x4a0   :  { %v351_v60 = vadd.f32 %v346_v59, %v2293_v47 }
 0x4a2   :  { %v355_v61 = vsel %vm86_vm0, %v351_v60, 0.0 }
 0x4a3   :  { %356 = vadd.xlane.f32.xlu0 %v355_v61 }
 0x4a5   :  { %v348_v62 = vpop.f32.mrf.mxu3 }
 0x4a6   :  { %v349_v63 = vadd.f32 %v1959_v57, %v348_v62 }
 0x4a8   :  { %v352_v0 = vadd.f32 %v349_v63, %v2297_v52 }
 0x4aa   :  { %v358_v1 = vsel %vm86_vm0, %v352_v0, 0.0 }
 0x4ab   :  { %359 = vadd.xlane.f32.xlu0 %v358_v1 }
 0x516   :  { %v357_v2 = vpop.xlane.xlu0 %356 }
 0x517   :  { %v361_v3 = vmul.f32 %v357_v2, %v2267_v10 }
 0x519   :  { %v363_v4 = vsub.f32 %v351_v60, %v361_v3  ;;  %v1963_v60 = vld [vmem:[%s2890_s13] ss:$0 sm:$0xff] }
 0x51b   :  { %v365_v5 = vmul.f32 %v363_v4, %v363_v4 }
 0x51d   :  { %v367_v6 = vsel %vm86_vm0, %v365_v5, 0.0 }
 0x51e   :  { %368 = vadd.xlane.f32.xlu0 %v367_v6  ;;  %v360_v7 = vpop.xlane.xlu0 %359 }
 0x51f   :  { %v362_v47 = vmul.f32 %v360_v7, %v2267_v10 }
 0x521   :  { %v2347_v8 = vsub.f32 %v352_v0, %v362_v47 }
 0x523   :  { %v366_v9 = vmul.f32 %v2347_v8, %v2347_v8 }
 0x525   :  { %v370_v52 = vsel %vm86_vm0, %v366_v9, 0.0 }
 0x526   :  { %371 = vadd.xlane.f32.xlu1 %v370_v52 }
 0x591   :  { %v369_v15 = vpop.xlane.xlu0 %368 }
 0x592   :  { %v373_v16 = vmul.f32 %v369_v15, %v2267_v10  ;;  %v586_v15 = vld [vmem:[%s2894_s18 + $0x30] sm:$0xff] }
 0x593   :  { %603 = vmatpush.msra.mxu3 %v586_v15 }
 0x594   :  { %v375_v17 = vadd.f32 1e-12, %v373_v16  ;;  %v587_v16 = vld [vmem:[%s2894_s18 + $0x38] sm:$0xff] }
 0x595   :  { %626 = vmatpush.msra.mxu1 %v587_v16  ;;  %604 = vmatpush.msra.mxu3 %v584_v18 }
 0x596   :  { %1984 = vrsqrt.f32 %v375_v17  ;;  %vm383_vm3 = vweird.f32 %v375_v17 }
 0x597   :  { %627 = vmatpush.msra.mxu1 %v585_v19 }
 0x599   :  { %v372_v21 = vpop.xlane.xlu1 %371 }
 0x59a   :  { %v374_v22 = vmul.f32 %v372_v21, %v2267_v10  ;;  %v582_v21 = vld [vmem:[%s2894_s18 + $0x10] sm:$0xff] }
 0x59b   :  { %605 = vmatpush.msra.mxu3 %v582_v21 }
 0x59c   :  { %v1985_v24 = vpop.eup %1984  ;;  %v376_v25 = vadd.f32 1e-12, %v374_v22  ;;  %v583_v22 = vld [vmem:[%s2894_s18 + $0x18] sm:$0xff] }
 0x59d   :  { %v378_v27 = vmul.f32 %v1985_v24, %v375_v17  ;;  %vm384_vm2 = vweird.f32 %v1985_v24  ;;  %v550_v17 = vld [vmem:[%s2893_s16 + $0x10] sm:$0xff]  ;;  %628 = vmatpush.msra.mxu1 %v583_v22 }
 0x59e   :  { %1986 = vrsqrt.f32 %v376_v25  ;;  %vm385_vm4 = vmor %vm383_vm3, %vm384_vm2  ;;  %vm393_vm6 = vweird.f32 %v376_v25  ;;  %572 = vmatpush.msra.mxu2 %v550_v17 }
 0x59f   :  { %v379_v28 = vmul.f32 %v1985_v24, %v378_v27 }
 0x5a0   :  { %573 = vmatpush.msra.mxu2 %v549_v20 }
 0x5a1   :  { %v380_v29 = vmul.f32 0.5, %v379_v28  ;;  %v2467_v28 = vld [vmem:[%s2895_s19 + $0x10] sm:$0xff] }
 0x5a2   :  { %574 = vmatpush.msra.mxu2 %v548_v23 }
 0x5a3   :  { %v381_v30 = vsub.f32 1.5, %v380_v29 }
 0x5a4   :  { %v1987_v31 = vpop.eup %1986 }
 0x5a5   :  { %v382_v32 = vmul.f32 %v1985_v24, %v381_v30  ;;  %v388_v33 = vmul.f32 %v1987_v31, %v376_v25  ;;  %vm394_vm5 = vweird.f32 %v1987_v31  ;;  %v581_v25 = vld [vmem:[%s2894_s18 + $0x8] sm:$0xff] }
 0x5a6   :  { %vm395_vm7 = vmor %vm393_vm6, %vm394_vm5  ;;  %629 = vmatpush.msra.mxu1 %v581_v25  ;;  %v2475_v30 = vld [vmem:[%s2895_s19 + $0x8] sm:$0xff] }
 0x5a7   :  { %v386_v35 = vsel %vm385_vm4, %v1985_v24, %v382_v32  ;;  %v389_v36 = vmul.f32 %v1987_v31, %v388_v33  ;;  %v580_v24 = vld [vmem:[%s2894_s18] sm:$0xff] }
 0x5a8   :  { %v397_v37 = vmul.f32 %v386_v35, %v363_v4  ;;  %606 = vmatpush.msra.mxu3 %v580_v24  ;;  %v2487_v33 = vld [vmem:[%s2895_s19] sm:$0xff]  ;;  %v2501_v35 = vld [vmem:[%s2896_s20 + $0x8] sm:$0xff] }
 0x5a9   :  { %v390_v39 = vmul.f32 0.5, %v389_v36  ;;  %v2506_v36 = vld [vmem:[%s2896_s20] sm:$0xff] }
 0x5aa   :  { %v402_v40 = vmul.f32 %v1960_v34, %v397_v37  ;;  %v2127_v37 = vmov 0.0  }
 0x5ab   :  { %v391_v41 = vsub.f32 1.5, %v390_v39 }
 0x5ac   :  { %v407_v42 = vadd.f32 %v1961_v38, %v402_v40 }
 0x5ad   :  { %v392_v43 = vmul.f32 %v1987_v31, %v391_v41 }
 0x5ae   :  { %1898 = vmatmul.msk.f32.vlgmr.msrb.gmra.mxu2 %vm86_vm0, %v407_v42 }
 0x5af   :  { %v396_v44 = vsel %vm395_vm7, %v1987_v31, %v392_v43  ;;  %662 = vmatpush.msrb.mxu2 %v2460_v26  ;;  %v2480_v31 = vld [vmem:[%s2896_s20 + $0x18] sm:$0xff] }
 0x5b0   :  { %v398_v45 = vmul.f32 %v396_v44, %v2347_v8  ;;  %687 = vmatpush.msrb.mxu0 %v2480_v31  ;;  %974 = vmatpush.msrb.mxu1 %v2480_v31 }
 0x5b1   :  { %663 = vmatpush.msrb.mxu2 %v2467_v28 }
 0x5b2   :  { %v403_v46 = vmul.f32 %v1960_v34, %v398_v45  ;;  %v2492_v34 = vld [vmem:[%s2896_s20 + $0x10] sm:$0xff] }
 0x5b3   :  { %664 = vmatpush.msrb.mxu2 %v2475_v30  ;;  %688 = vmatpush.msrb.mxu0 %v2492_v34 }
 0x5b4   :  { %v408_v48 = vadd.f32 %v1961_v38, %v403_v46  ;;  %975 = vmatpush.msrb.mxu1 %v2492_v34 }
 0x5b5   :  { %665 = vmatpush.msrb.mxu2 %v2487_v33  ;;  %689 = vmatpush.msrb.mxu0 %v2501_v35 }
 0x5b6   :  { %1899 = vmatmul.msk.f32.gmra.mxu2 %vm86_vm0, %v408_v48  ;;  %976 = vmatpush.msrb.mxu1 %v2501_v35 }
 0x5b7   :  { %690 = vmatpush.msrb.mxu0 %v2506_v36 }
 0x5b8   :  { %977 = vmatpush.msrb.mxu1 %v2506_v36 }
 0x631   :  { %v440_v54 = vpop.f32.mrf.mxu2 }
 0x632   :  { %v441_v55 = vadd.f32 %v1962_v53, %v440_v54 }
 0x634   :  { %v446_v56 = vmax.f32 %v441_v55, 0.0 }
 0x636   :  { %1900 = vmatmul.msk.f32.vlgmr.msra.gmra.mxu0 %vm460_vm8, %v446_v56 }
 0x637   :  { %944 = vmatpush.msra.mxu0 %v2460_v26 }
 0x639   :  { %v443_v57 = vpop.f32.mrf.mxu2  ;;  %945 = vmatpush.msra.mxu0 %v2467_v28 }
 0x63a   :  { %v444_v58 = vadd.f32 %v1962_v53, %v443_v57 }
 0x63b   :  { %946 = vmatpush.msra.mxu0 %v2475_v30 }
 0x63c   :  { %v447_v59 = vmax.f32 %v444_v58, 0.0 }
 0x63d   :  { %947 = vmatpush.msra.mxu0 %v2487_v33 }
 0x63e   :  { %1901 = vmatmul.msk.f32.vlgmr.msrb.gmra.mxu3 %vm460_vm8, %v447_v59  ;;  %691 = vmatmul.f32.vlgmr.msrb.gmra.mxu0 %v2127_v37 }
 0x63f   :  { %796 = vmatpush.msrb.mxu3 %v2460_v26  ;;  %1235 = vmatpush.msrb.mxu0 %v2460_v26 }
 0x641   :  { %797 = vmatpush.msrb.mxu3 %v2467_v28  ;;  %1236 = vmatpush.msrb.mxu0 %v2467_v28 }
 0x643   :  { %798 = vmatpush.msrb.mxu3 %v2475_v30  ;;  %1237 = vmatpush.msrb.mxu0 %v2475_v30 }
 0x645   :  { %799 = vmatpush.msrb.mxu3 %v2487_v33  ;;  %1238 = vmatpush.msrb.mxu0 %v2487_v33 }
 0x6b3   :  { %v484_v61 = vpop.f32.mrf.mxu0 }
 0x6b4   :  { %v485_v62 = vadd.f32 %v1963_v60, %v484_v61 }
 0x6b6   :  { %v490_v63 = vadd.f32 %v485_v62, %v407_v42 }
 0x6b8   :  { %v494_v0 = vsel %vm86_vm0, %v490_v63, 0.0 }
 0x6b9   :  { %495 = vadd.xlane.f32.xlu0 %v494_v0 }
 0x6c1   :  { %v487_v1 = vpop.f32.mrf.mxu3 }
 0x6c2   :  { %v488_v2 = vadd.f32 %v1963_v60, %v487_v1 }
 0x6c4   :  { %v491_v3 = vadd.f32 %v488_v2, %v408_v48  ;;  %v1964_v48 = vld [vmem:[%s2891_s14] ss:$0 sm:$0xff]  ;;  %v692_v2 = vpop.f32.mrf.mxu0 }
 0x6c6   :  { %v497_v4 = vsel %vm86_vm0, %v491_v3, 0.0 }
 0x6c7   :  { %498 = vadd.xlane.f32.xlu2 %v497_v4 }
 0x72c   :  { %v496_v5 = vpop.xlane.xlu0 %495 }
 0x72d   :  { %v500_v6 = vmul.f32 %v496_v5, %v2267_v10  ;;  %v2561_v5 = vld [vmem:[%s2898_s22] ss:$0 sm:$0xff] }
 0x72f   :  { %v2410_v7 = vsub.f32 %v490_v63, %v500_v6  ;;  %v2566_v6 = vld [vmem:[%s2899_s21] ss:$0 sm:$0xff] }
 0x731   :  { %v504_v47 = vmul.f32 %v2410_v7, %v2410_v7 }
 0x733   :  { %v506_v8 = vsel %vm86_vm0, %v504_v47, 0.0 }
 0x734   :  { %507 = vadd.xlane.f32.xlu0 %v506_v8 }
 0x73a   :  { %v499_v9 = vpop.xlane.xlu2 %498 }
 0x73b   :  { %v501_v52 = vmul.f32 %v499_v9, %v2267_v10 }
 0x73d   :  { %v2416_v11 = vsub.f32 %v491_v3, %v501_v52  ;;  %v696_v3 = vrot.slane %v692_v2, 2 }
 0x73f   :  { %v505_v12 = vmul.f32 %v2416_v11, %v2416_v11 }
 0x741   :  { %v509_v13 = vsel %vm86_vm0, %v505_v12, 0.0 }
 0x742   :  { %510 = vadd.xlane.f32.xlu2 %v509_v13 }
 0x7a7   :  { %v508_v27 = vpop.xlane.xlu0 %507 }
 0x7a8   :  { %v512_v29 = vmul.f32 %v508_v27, %v2267_v10 }
 0x7aa   :  { %v514_v32 = vadd.f32 1e-12, %v512_v29 }
 0x7ac   :  { %1988 = vrsqrt.f32 %v514_v32  ;;  %vm522_vm10 = vweird.f32 %v514_v32 }
 0x7b2   :  { %v1989_v38 = vpop.eup %1988 }
 0x7b3   :  { %v517_v39 = vmul.f32 %v1989_v38, %v514_v32  ;;  %vm523_vm9 = vweird.f32 %v1989_v38 }
 0x7b4   :  { %vm524_vm11 = vmor %vm522_vm10, %vm523_vm9 }
 0x7b5   :  { %v518_v40 = vmul.f32 %v1989_v38, %v517_v39  ;;  %v511_v41 = vpop.xlane.xlu2 %510 }
 0x7b6   :  { %v513_v42 = vmul.f32 %v511_v41, %v2267_v10 }
 0x7b7   :  { %v519_v43 = vmul.f32 0.5, %v518_v40 }
 0x7b8   :  { %v515_v44 = vadd.f32 1e-12, %v513_v42 }
 0x7b9   :  { %v520_v45 = vsub.f32 1.5, %v519_v43 }
 0x7ba   :  { %1990 = vrsqrt.f32 %v515_v44  ;;  %vm532_vm13 = vweird.f32 %v515_v44 }
 0x7bb   :  { %v521_v46 = vmul.f32 %v1989_v38, %v520_v45 }
 0x7bd   :  { %v525_v10 = vsel %vm524_vm11, %v1989_v38, %v521_v46 }
 0x7be   :  { %v536_v49 = vmul.f32 %v525_v10, %v2410_v7 }
 0x7c0   :  { %v1991_v51 = vpop.eup %1990  ;;  %v541_v53 = vmul.f32 %v1964_v48, %v536_v49 }
 0x7c1   :  { %v527_v54 = vmul.f32 %v1991_v51, %v515_v44  ;;  %vm533_vm12 = vweird.f32 %v1991_v51 }
 0x7c2   :  { %v546_v55 = vadd.f32 %v1965_v50, %v541_v53  ;;  %vm534_vm14 = vmor %vm532_vm13, %vm533_vm12 }
 0x7c3   :  { %v528_v56 = vmul.f32 %v1991_v51, %v527_v54 }
 0x7c4   :  { %1902 = vmatmul.msk.f32.vlgmr.msra.gmra.mxu2 %vm86_vm0, %v546_v55  ;;  %1903 = vmatmul.msk.f32.vlgmr.msra.gmra.mxu3 %vm86_vm0, %v546_v55 }
 0x7c5   :  { %v529_v57 = vmul.f32 0.5, %v528_v56  ;;  %1905 = vmatmul.msk.f32.vlgmr.msra.gmra.mxu1 %vm86_vm0, %v546_v55  ;;  %827 = vmatpush.msra.mxu2 %v2480_v31 }
 0x7c6   :  { %1091 = vmatpush.msra.mxu3 %v2460_v26  ;;  %1261 = vmatpush.msra.mxu1 %v2480_v31 }
 0x7c7   :  { %v530_v58 = vsub.f32 1.5, %v529_v57  ;;  %828 = vmatpush.msra.mxu2 %v2492_v34 }
 0x7c8   :  { %1092 = vmatpush.msra.mxu3 %v2467_v28  ;;  %1262 = vmatpush.msra.mxu1 %v2492_v34 }
 0x7c9   :  { %v531_v59 = vmul.f32 %v1991_v51, %v530_v58  ;;  %829 = vmatpush.msra.mxu2 %v2501_v35 }
 0x7ca   :  { %1093 = vmatpush.msra.mxu3 %v2475_v30  ;;  %1263 = vmatpush.msra.mxu1 %v2501_v35 }
 0x7cb   :  { %v535_v60 = vsel %vm534_vm14, %v1991_v51, %v531_v59  ;;  %830 = vmatpush.msra.mxu2 %v2506_v36 }
 0x7cc   :  { %666 = vmatmul.f32.vlgmr.msrb.gmra.mxu2 %v2127_v37  ;;  %v537_v61 = vmul.f32 %v535_v60, %v2416_v11  ;;  %1094 = vmatpush.msra.mxu3 %v2487_v33 }
 0x7cd   :  { %1121 = vmatpush.msrb.mxu2 %v2480_v31  ;;  %1264 = vmatpush.msra.mxu1 %v2506_v36 }
 0x7ce   :  { %v542_v62 = vmul.f32 %v1964_v48, %v537_v61 }
 0x7cf   :  { %1122 = vmatpush.msrb.mxu2 %v2492_v34 }
 0x7d0   :  { %v547_v63 = vadd.f32 %v1965_v50, %v542_v62 }
 0x7d1   :  { %1123 = vmatpush.msrb.mxu2 %v2501_v35 }
 0x7d2   :  { %1904 = vmatmul.msk.f32.gmra.mxu3 %vm86_vm0, %v547_v63  ;;  %1906 = vmatmul.msk.f32.gmra.mxu1 %vm86_vm0, %v547_v63 }
 0x7d3   :  { %1124 = vmatpush.msrb.mxu2 %v2506_v36 }
 0x842   :  { %v2552_v0 = vpop.f32.mrf.mxu1 }
 0x847   :  { %v2554_v1 = vpop.f32.mrf.mxu2  ;;  %v2556_v4 = vpop.f32.mrf.mxu3 }
 0x84f   :  { %v2568_v7 = vpop.f32.mrf.mxu1  ;;  %v667_v47 = vpop.f32.mrf.mxu2 }
 0x850   :  { %v698_v8 = vadd.f32 %v696_v3, %v2568_v7  ;;  %v670_v9 = vadd.f32 %v667_v47, %v2556_v4 }
 0x852   :  { %v702_v52 = vadd.f32 %v2561_v5, %v698_v8  ;;  %v674_v11 = vadd.f32 %v2566_v6, %v670_v9 }
 0x854   :  { %1992 = vtanh.f32 %v702_v52  ;;  %v1907_v14 = vmul.f32 -1.442695, %v674_v11  ;;  %v1908_v18 = vmul.f32 -1.442695, %v702_v52 }
 0x855   :  { %1994 = vtanh.f32 %v674_v11  ;;  %v2604_v9 = vpop.f32.mrf.mxu3 }
 0x856   :  { %1996 = vpow2.f32 %v1907_v14 }
 0x85a   :  { %v1993_v12 = vpop.eup %1992 }
 0x85b   :  { %v1995_v13 = vpop.eup %1994  ;;  %762 = vrot.lane.b32.xlu0 %v1993_v12, %s2126_s0 }
 0x85c   :  { %725 = vrot.lane.b32.xlu2 %v1995_v13, %s2126_s0  ;;  %v1997_v15 = vpop.eup %1996 }
 0x85d   :  { %v706_v16 = vadd.f32 1.0, %v1997_v15 }
 0x85f   :  { %1998 = vrcp.f32 %v706_v16  ;;  %v718_v25 = vand.u32 2147483648, %v706_v16  ;;  %vm712_vm1 = vweird.f32 %v706_v16  ;;  %v716_v27 = vand.u32 2147483647, %v706_v16 }
 0x860   :  { %2000 = vpow2.f32 %v1908_v18 }
 0x861   :  { %v719_v32 = vor.u32 1.1754944e-38, %v718_v25  ;;  %vm717_vm3 = vcmp.eq.f32.partialorder %v716_v27, 8.507059e+37 }
 0x865   :  { %v1999_v17 = vpop.eup %1998 }
 0x866   :  { %v708_v19 = vmul.f32 %v1999_v17, %v706_v16  ;;  %v2001_v21 = vpop.eup %2000  ;;  %vm713_vm15 = vweird.f32 %v1999_v17 }
 0x867   :  { %v743_v23 = vadd.f32 1.0, %v2001_v21  ;;  %vm714_vm2 = vmor %vm712_vm1, %vm713_vm15 }
 0x868   :  { %v709_v20 = vsub.f32 1.0, %v708_v19 }
 0x869   :  { %2002 = vrcp.f32 %v743_v23  ;;  %v755_v45 = vand.u32 2147483648, %v743_v23  ;;  %vm749_vm5 = vweird.f32 %v743_v23  ;;  %v753_v46 = vand.u32 2147483647, %v743_v23 }
 0x86a   :  { %v710_v22 = vmul.f32 %v1999_v17, %v709_v20 }
 0x86b   :  { %v756_v10 = vor.u32 1.1754944e-38, %v755_v45  ;;  %vm754_vm7 = vcmp.eq.f32.partialorder %v753_v46, 8.507059e+37 }
 0x86c   :  { %v711_v24 = vadd.f32 %v1999_v17, %v710_v22 }
 0x86e   :  { %v715_v29 = vsel %vm714_vm2, %v1999_v17, %v711_v24 }
 0x86f   :  { %v720_v38 = vsel %vm717_vm3, %v719_v32, %v715_v29  ;;  %v2003_v39 = vpop.eup %2002 }
 0x870   :  { %v745_v41 = vmul.f32 %v2003_v39, %v743_v23  ;;  %vm750_vm4 = vweird.f32 %v2003_v39  ;;  %v723_v53 = vmul.f32 0.0, %v720_v38 }
 0x871   :  { %vm751_vm6 = vmor %vm749_vm5, %vm750_vm4 }
 0x872   :  { %v746_v42 = vsub.f32 1.0, %v745_v41 }
 0x874   :  { %v747_v43 = vmul.f32 %v2003_v39, %v746_v42 }
 0x876   :  { %v748_v44 = vadd.f32 %v2003_v39, %v747_v43 }
 0x878   :  { %v752_v48 = vsel %vm751_vm6, %v2003_v39, %v748_v44 }
 0x879   :  { %v757_v50 = vsel %vm754_vm7, %v756_v10, %v752_v48 }
 0x87a   :  { %v760_v57 = vmul.f32 0.0, %v757_v50 }
 0x8b6   :  { %v726_v37 = vpop.permute.xlu2 %725 }
 0x8b7   :  { %v728_v40 = vmul.f32 %v726_v37, %v720_v38 }
 0x8b9   :  { %730 = vrot.lane.b32.xlu0 %v728_v40, %s2128_s28 }
 0x8cd   :  { %v763_v49 = vpop.permute.xlu0 %762 }
 0x8ce   :  { %v765_v51 = vmul.f32 %v763_v49, %v757_v50 }
 0x8d0   :  { %767 = vrot.lane.b32.xlu1 %v765_v51, %s2128_s28 }
 0x92b   :  { %v731_v54 = vpop.permute.xlu0 %730 }
 0x92c   :  { %v2578_v55 = vadd.f32 %v731_v54, %v723_v53 }
 0x92e   :  { %2004 = vtanh.f32 %v2578_v55 }
 0x934   :  { %v2005_v56 = vpop.eup %2004 }
 0x935   :  { %736 = vrot.lane.b32.xlu0 %v2005_v56, %s2126_s0 }
 0x942   :  { %v768_v58 = vpop.permute.xlu1 %767 }
 0x943   :  { %v2582_v59 = vadd.f32 %v768_v58, %v760_v57 }
 0x945   :  { %2006 = vtanh.f32 %v2582_v59 }
 0x94b   :  { %v2007_v60 = vpop.eup %2006 }
 0x94c   :  { %773 = vrot.lane.b32.xlu2 %v2007_v60, %s2126_s0 }
 0x9a6   :  { %v774_v61 = vpop.permute.xlu2 %773 }
 0x9a7   :  { %v2586_v62 = vmul.f32 %v774_v61, %v757_v50  ;;  %v737_v63 = vpop.permute.xlu0 %736  ;;  %v861_v61 = vrot.slane %v2578_v55, 6 }
 0x9a8   :  { %v2588_v2 = vmul.f32 %v737_v63, %v720_v38 }
 0x9a9   :  { %v810_v3 = vrot.slane %v2586_v62, 6 }
 0x9aa   :  { %780 = vrot.lane.b32.xlu2 %v2588_v2, %s2128_s28 }
 0x9ab   :  { %811 = vrot.lane.b32.xlu0 %v810_v3, %s2128_s28 }
 0xa04   :  { %v781_v47 = vpop.permute.xlu2 %780 }
 0xa05   :  { %1909 = vmatmul.msk.f32.vlgmr.msrb.gmra.mxu3 %vm86_vm0, %v781_v47 }
 0xa06   :  { %1373 = vmatpush.msrb.mxu3 %v2460_v26 }
 0xa08   :  { %1374 = vmatpush.msrb.mxu3 %v2467_v28 }
 0xa0a   :  { %1375 = vmatpush.msrb.mxu3 %v2475_v30 }
 0xa0c   :  { %1376 = vmatpush.msrb.mxu3 %v2487_v33 }
 0xa1d   :  { %v812_v8 = vpop.permute.xlu0 %811 }
 0xa1e   :  { %1910 = vmatmul.msk.f32.vlgmr.msra.gmra.mxu2 %vm86_vm0, %v812_v8 }
 0xa1f   :  { %1404 = vmatpush.msra.mxu2 %v2480_v31 }
 0xa21   :  { %1405 = vmatpush.msra.mxu2 %v2492_v34 }
 0xa23   :  { %1406 = vmatpush.msra.mxu2 %v2501_v35 }
 0xa25   :  { %1407 = vmatpush.msra.mxu2 %v2506_v36 }
 0xa88   :  { %v801_v52 = vpop.f32.mrf.mxu3 }
 0xa89   :  { %v805_v11 = vrot.slane %v801_v52, 6  ;;  %v901_v52 = vrot.slane %v2582_v59, 2 }
 0xa8b   :  { %v807_v12 = vadd.f32 %v805_v11, %v2556_v4 }
 0xa8d   :  { %v808_v13 = vadd.f32 %v2566_v6, %v807_v12 }
 0xa8f   :  { %2008 = vtanh.f32 %v808_v13  ;;  %v1911_v20 = vmul.f32 -1.442695, %v808_v13 }
 0xa95   :  { %v2009_v14 = vpop.eup %2008 }
 0xa96   :  { %865 = vrot.lane.b32.xlu2 %v2009_v14, %s2126_s0 }
 0xaa1   :  { %v832_v15 = vpop.f32.mrf.mxu2 }
 0xaa2   :  { %v836_v16 = vrot.slane %v832_v15, 4 }
 0xaa4   :  { %v838_v17 = vadd.f32 %v836_v16, %v2568_v7 }
 0xaa6   :  { %v839_v18 = vadd.f32 %v2561_v5, %v838_v17 }
 0xaa8   :  { %2010 = vtanh.f32 %v839_v18  ;;  %v1912_v43 = vmul.f32 -1.442695, %v839_v18 }
 0xaa9   :  { %2012 = vpow2.f32 %v1911_v20 }
 0xaae   :  { %v2011_v19 = vpop.eup %2010 }
 0xaaf   :  { %905 = vrot.lane.b32.xlu0 %v2011_v19, %s2126_s0  ;;  %v2013_v21 = vpop.eup %2012 }
 0xab0   :  { %v843_v22 = vadd.f32 1.0, %v2013_v21 }
 0xab2   :  { %2014 = vrcp.f32 %v843_v22  ;;  %v855_v32 = vand.u32 2147483648, %v843_v22  ;;  %vm849_vm10 = vweird.f32 %v843_v22  ;;  %v853_v37 = vand.u32 2147483647, %v843_v22 }
 0xab3   :  { %2016 = vpow2.f32 %v1912_v43 }
 0xab4   :  { %v856_v39 = vor.u32 1.1754944e-38, %v855_v32  ;;  %vm854_vm12 = vcmp.eq.f32.partialorder %v853_v37, 8.507059e+37 }
 0xab8   :  { %v2015_v23 = vpop.eup %2014 }
 0xab9   :  { %v845_v24 = vmul.f32 %v2015_v23, %v843_v22  ;;  %vm850_vm9 = vweird.f32 %v2015_v23  ;;  %v2017_v44 = vpop.eup %2016 }
 0xaba   :  { %vm851_vm11 = vmor %vm849_vm10, %vm850_vm9  ;;  %v883_v45 = vadd.f32 1.0, %v2017_v44 }
 0xabb   :  { %v846_v25 = vsub.f32 1.0, %v845_v24 }
 0xabc   :  { %2018 = vrcp.f32 %v883_v45  ;;  %v895_v51 = vand.u32 2147483648, %v883_v45  ;;  %vm889_vm14 = vweird.f32 %v883_v45  ;;  %v893_v53 = vand.u32 2147483647, %v883_v45 }
 0xabd   :  { %v847_v27 = vmul.f32 %v2015_v23, %v846_v25 }
 0xabe   :  { %v896_v56 = vor.u32 1.1754944e-38, %v895_v51  ;;  %vm894_vm1 = vcmp.eq.f32.partialorder %v893_v53, 8.507059e+37 }
 0xabf   :  { %v848_v29 = vadd.f32 %v2015_v23, %v847_v27 }
 0xac1   :  { %v852_v38 = vsel %vm851_vm11, %v2015_v23, %v848_v29 }
 0xac2   :  { %v857_v41 = vsel %vm854_vm12, %v856_v39, %v852_v38  ;;  %v2019_v46 = vpop.eup %2018 }
 0xac3   :  { %v885_v48 = vmul.f32 %v2019_v46, %v883_v45  ;;  %vm890_vm13 = vweird.f32 %v2019_v46  ;;  %v863_v63 = vmul.f32 %v861_v61, %v857_v41 }
 0xac4   :  { %vm891_vm15 = vmor %vm889_vm14, %vm890_vm13 }
 0xac5   :  { %v886_v10 = vsub.f32 1.0, %v885_v48 }
 0xac7   :  { %v887_v49 = vmul.f32 %v2019_v46, %v886_v10 }
 0xac9   :  { %v888_v50 = vadd.f32 %v2019_v46, %v887_v49 }
 0xacb   :  { %v892_v54 = vsel %vm891_vm15, %v2019_v46, %v888_v50 }
 0xacc   :  { %v897_v58 = vsel %vm894_vm1, %v896_v56, %v892_v54 }
 0xacd   :  { %v903_v11 = vmul.f32 %v901_v52, %v897_v58 }
 0xaf0   :  { %v866_v40 = vpop.permute.xlu2 %865 }
 0xaf1   :  { %v868_v42 = vmul.f32 %v866_v40, %v857_v41 }
 0xaf3   :  { %870 = vrot.lane.b32.xlu1 %v868_v42, %s2128_s28 }
 0xb21   :  { %v906_v57 = vpop.permute.xlu0 %905 }
 0xb22   :  { %v908_v60 = vmul.f32 %v906_v57, %v897_v58 }
 0xb24   :  { %910 = vrot.lane.b32.xlu2 %v908_v60, %s2128_s28 }
 0xb65   :  { %v871_v3 = vpop.permute.xlu1 %870 }
 0xb66   :  { %v2615_v47 = vadd.f32 %v871_v3, %v863_v63 }
 0xb68   :  { %2020 = vtanh.f32 %v2615_v47 }
 0xb6e   :  { %v2021_v8 = vpop.eup %2020 }
 0xb6f   :  { %876 = vrot.lane.b32.xlu0 %v2021_v8, %s2126_s0 }
 0xb7e   :  { %v911_v12 = vpop.permute.xlu2 %910 }
 0xb7f   :  { %v2620_v13 = vadd.f32 %v911_v12, %v903_v11 }
 0xb81   :  { %2022 = vtanh.f32 %v2620_v13 }
 0xb87   :  { %v2023_v14 = vpop.eup %2022 }
 0xb88   :  { %916 = vrot.lane.b32.xlu1 %v2023_v14, %s2126_s0 }
 0xbe1   :  { %v877_v55 = vpop.permute.xlu0 %876 }
 0xbe2   :  { %v2624_v15 = vmul.f32 %v877_v55, %v857_v41 }
 0xbe4   :  { %v921_v16 = vrot.slane %v2624_v15, 2 }
 0xbe6   :  { %928 = vrot.lane.b32.xlu2 %v921_v16, %s2128_s28 }
 0xbfa   :  { %v917_v17 = vpop.permute.xlu1 %916 }
 0xbfb   :  { %v2630_v59 = vmul.f32 %v917_v17, %v897_v58 }
 0xbfd   :  { %v957_v18 = vrot.slane %v2630_v59, 4 }
 0xbff   :  { %958 = vrot.lane.b32.xlu0 %v957_v18, %s2128_s28 }
 0xc40   :  { %v929_v19 = vpop.permute.xlu2 %928 }
 0xc41   :  { %1913 = vmatmul.msk.f32.vlgmr.msra.gmra.mxu0 %vm86_vm0, %v929_v19  ;;  %v1008_v19 = vrot.slane %v2615_v47, 6 }
 0xc42   :  { %1521 = vmatpush.msra.mxu0 %v2460_v26 }
 0xc44   :  { %1522 = vmatpush.msra.mxu0 %v2467_v28 }
 0xc46   :  { %1523 = vmatpush.msra.mxu0 %v2475_v30 }
 0xc48   :  { %1524 = vmatpush.msra.mxu0 %v2487_v33 }
 0xc71   :  { %v959_v20 = vpop.permute.xlu0 %958 }
 0xc72   :  { %1914 = vmatmul.msk.f32.vlgmr.msrb.gmra.mxu1 %vm86_vm0, %v959_v20 }
 0xc73   :  { %1551 = vmatpush.msrb.mxu1 %v2480_v31 }
 0xc75   :  { %1552 = vmatpush.msrb.mxu1 %v2492_v34 }
 0xc77   :  { %1553 = vmatpush.msrb.mxu1 %v2501_v35 }
 0xc79   :  { %1554 = vmatpush.msrb.mxu1 %v2506_v36 }
 0xcbe   :  { %v949_v21 = vpop.f32.mrf.mxu0 }
 0xcbf   :  { %v953_v22 = vrot.slane %v949_v21, 4 }
 0xcc1   :  { %v955_v23 = vadd.f32 %v953_v22, %v2556_v4 }
 0xcc3   :  { %v956_v24 = vadd.f32 %v2566_v6, %v955_v23 }
 0xcc5   :  { %2024 = vtanh.f32 %v956_v24  ;;  %v1915_v39 = vmul.f32 -1.442695, %v956_v24  ;;  %v1048_v24 = vrot.slane %v2620_v13, 2  ;;  %v925_v13 = vrot.slane %v2630_v59, 6 }
 0xccb   :  { %v2025_v25 = vpop.eup %2024 }
 0xccc   :  { %1012 = vrot.lane.b32.xlu1 %v2025_v25, %s2126_s0 }
 0xcef   :  { %v979_v27 = vpop.f32.mrf.mxu1 }
 0xcf0   :  { %v983_v29 = vrot.slane %v979_v27, 6 }
 0xcf2   :  { %v985_v32 = vadd.f32 %v983_v29, %v2568_v7 }
 0xcf4   :  { %v986_v37 = vadd.f32 %v2561_v5, %v985_v32 }
 0xcf6   :  { %2026 = vtanh.f32 %v986_v37  ;;  %v1916_v43 = vmul.f32 -1.442695, %v986_v37 }
 0xcf7   :  { %2028 = vpow2.f32 %v1915_v39 }
 0xcfc   :  { %v2027_v38 = vpop.eup %2026 }
 0xcfd   :  { %1052 = vrot.lane.b32.xlu2 %v2027_v38, %s2126_s0  ;;  %v2029_v40 = vpop.eup %2028  ;;  %v923_v38 = vadd.f32 %v921_v16, %v2588_v2 }
 0xcfe   :  { %v990_v41 = vadd.f32 1.0, %v2029_v40 }
 0xd00   :  { %2030 = vrcp.f32 %v990_v41  ;;  %v1002_v50 = vand.u32 2147483648, %v990_v41  ;;  %vm996_vm3 = vweird.f32 %v990_v41  ;;  %v1000_v51 = vand.u32 2147483647, %v990_v41 }
 0xd01   :  { %2032 = vpow2.f32 %v1916_v43  ;;  %v927_v43 = vadd.f32 %v925_v13, %v2586_v62 }
 0xd02   :  { %v1003_v54 = vor.u32 1.1754944e-38, %v1002_v50  ;;  %vm1001_vm5 = vcmp.eq.f32.partialorder %v1000_v51, 8.507059e+37 }
 0xd06   :  { %v2031_v42 = vpop.eup %2030 }
 0xd07   :  { %v992_v44 = vmul.f32 %v2031_v42, %v990_v41  ;;  %v2033_v48 = vpop.eup %2032  ;;  %vm997_vm2 = vweird.f32 %v2031_v42 }
 0xd08   :  { %v1030_v10 = vadd.f32 1.0, %v2033_v48  ;;  %vm998_vm4 = vmor %vm996_vm3, %vm997_vm2 }
 0xd09   :  { %v993_v45 = vsub.f32 1.0, %v992_v44 }
 0xd0a   :  { %2034 = vrcp.f32 %v1030_v10  ;;  %v1042_v52 = vand.u32 2147483648, %v1030_v10  ;;  %vm1036_vm7 = vweird.f32 %v1030_v10  ;;  %v1040_v11 = vand.u32 2147483647, %v1030_v10 }
 0xd0b   :  { %v994_v46 = vmul.f32 %v2031_v42, %v993_v45 }
 0xd0c   :  { %v1043_v14 = vor.u32 1.1754944e-38, %v1042_v52  ;;  %vm1041_vm10 = vcmp.eq.f32.partialorder %v1040_v11, 8.507059e+37 }
 0xd0d   :  { %v995_v49 = vadd.f32 %v2031_v42, %v994_v46 }
 0xd0f   :  { %v999_v53 = vsel %vm998_vm4, %v2031_v42, %v995_v49 }
 0xd10   :  { %v1004_v56 = vsel %vm1001_vm5, %v1003_v54, %v999_v53  ;;  %v2035_v60 = vpop.eup %2034 }
 0xd11   :  { %v1032_v61 = vmul.f32 %v2035_v60, %v1030_v10  ;;  %vm1037_vm6 = vweird.f32 %v2035_v60  ;;  %v1010_v20 = vmul.f32 %v1008_v19, %v1004_v56 }
 0xd12   :  { %vm1038_vm9 = vmor %vm1036_vm7, %vm1037_vm6 }
 0xd13   :  { %v1033_v63 = vsub.f32 1.0, %v1032_v61 }
 0xd15   :  { %v1034_v3 = vmul.f32 %v2035_v60, %v1033_v63 }
 0xd17   :  { %v1035_v8 = vadd.f32 %v2035_v60, %v1034_v3 }
 0xd19   :  { %v1039_v12 = vsel %vm1038_vm9, %v2035_v60, %v1035_v8 }
 0xd1a   :  { %v1044_v17 = vsel %vm1041_vm10, %v1043_v14, %v1039_v12 }
 0xd1b   :  { %v1050_v25 = vmul.f32 %v1048_v24, %v1044_v17 }
 0xd3e   :  { %v1013_v57 = vpop.permute.xlu1 %1012 }
 0xd3f   :  { %v1015_v58 = vmul.f32 %v1013_v57, %v1004_v56 }
 0xd41   :  { %1017 = vrot.lane.b32.xlu0 %v1015_v58, %s2128_s28 }
 0xd57   :  { %v1053_v55 = vpop.permute.xlu2 %1052 }
 0xd58   :  { %v1055_v18 = vmul.f32 %v1053_v55, %v1044_v17 }
 0xd5a   :  { %1057 = vrot.lane.b32.xlu1 %v1055_v18, %s2128_s28 }
 0xdb3   :  { %v1018_v21 = vpop.permute.xlu0 %1017 }
 0xdb4   :  { %v2653_v22 = vadd.f32 %v1018_v21, %v1010_v20 }
 0xdb6   :  { %2036 = vtanh.f32 %v2653_v22 }
 0xdbc   :  { %v2037_v23 = vpop.eup %2036 }
 0xdbd   :  { %1023 = vrot.lane.b32.xlu2 %v2037_v23, %s2126_s0 }
 0xdcc   :  { %v1058_v27 = vpop.permute.xlu1 %1057 }
 0xdcd   :  { %v2658_v29 = vadd.f32 %v1058_v27, %v1050_v25  ;;  %v1152_v25 = vrot.slane %v2653_v22, 6 }
 0xdcf   :  { %2038 = vtanh.f32 %v2658_v29  ;;  %v1192_v24 = vrot.slane %v2658_v29, 2 }
 0xdd5   :  { %v2039_v32 = vpop.eup %2038 }
 0xdd6   :  { %1063 = vrot.lane.b32.xlu0 %v2039_v32, %s2126_s0 }
 0xe17   :  { %v1024_v47 = vpop.permute.xlu2 %1023 }
 0xe18   :  { %v1026_v37 = vmul.f32 %v1024_v47, %v1004_v56 }
 0xe1a   :  { %v1068_v39 = vrot.slane %v1026_v37, 4 }
 0xe1c   :  { %v2665_v40 = vadd.f32 %v1068_v39, %v923_v38  ;;  %1075 = vrot.lane.b32.xlu1 %v1068_v39, %s2128_s28 }
 0xe48   :  { %v1064_v41 = vpop.permute.xlu0 %1063 }
 0xe49   :  { %v1066_v42 = vmul.f32 %v1064_v41, %v1044_v17 }
 0xe4b   :  { %v1072_v44 = vrot.slane %v1066_v42, 4  ;;  %v1104_v45 = vrot.slane %v1066_v42, 2 }
 0xe4d   :  { %v2670_v46 = vadd.f32 %v1072_v44, %v927_v43  ;;  %1105 = vrot.lane.b32.xlu2 %v1104_v45, %s2128_s28 }
 0xe8e   :  { %v1076_v48 = vpop.permute.xlu1 %1075 }
 0xe8f   :  { %1917 = vmatmul.msk.f32.vlgmr.msra.gmra.mxu3 %vm86_vm0, %v1076_v48 }
 0xe90   :  { %1668 = vmatpush.msra.mxu3 %v2460_v26 }
 0xe92   :  { %1669 = vmatpush.msra.mxu3 %v2467_v28 }
 0xe94   :  { %1670 = vmatpush.msra.mxu3 %v2475_v30 }
 0xe96   :  { %1671 = vmatpush.msra.mxu3 %v2487_v33 }
 0xea7   :  { %v1106_v2 = vpop.permute.xlu2 %1105 }
 0xea8   :  { %1918 = vmatmul.msk.f32.vlgmr.msrb.gmra.mxu2 %vm86_vm0, %v1106_v2 }
 0xea9   :  { %1698 = vmatpush.msrb.mxu2 %v2480_v31 }
 0xeab   :  { %1699 = vmatpush.msrb.mxu2 %v2492_v34 }
 0xead   :  { %1700 = vmatpush.msrb.mxu2 %v2501_v35 }
 0xeaf   :  { %1701 = vmatpush.msrb.mxu2 %v2506_v36 }
 0xf12   :  { %v1096_v62 = vpop.f32.mrf.mxu3 }
 0xf13   :  { %v1100_v15 = vrot.slane %v1096_v62, 2 }
 0xf15   :  { %v1102_v26 = vadd.f32 %v1100_v15, %v2556_v4 }
 0xf17   :  { %v1103_v28 = vadd.f32 %v2566_v6, %v1102_v26 }
 0xf19   :  { %2040 = vtanh.f32 %v1103_v28  ;;  %v1919_v35 = vmul.f32 -1.442695, %v1103_v28 }
 0xf1f   :  { %v2041_v30 = vpop.eup %2040 }
 0xf20   :  { %1156 = vrot.lane.b32.xlu1 %v2041_v30, %s2126_s0 }
 0xf2b   :  { %v1126_v33 = vpop.f32.mrf.mxu2 }
 0xf2c   :  { %v1129_v16 = vadd.f32 %v1126_v33, %v2568_v7 }
 0xf2e   :  { %v1130_v31 = vadd.f32 %v2561_v5, %v1129_v16 }
 0xf30   :  { %2042 = vtanh.f32 %v1130_v31  ;;  %v1920_v10 = vmul.f32 -1.442695, %v1130_v31 }
 0xf31   :  { %2044 = vpow2.f32 %v1919_v35 }
 0xf36   :  { %v2043_v34 = vpop.eup %2042 }
 0xf37   :  { %1196 = vrot.lane.b32.xlu0 %v2043_v34, %s2126_s0  ;;  %v2045_v36 = vpop.eup %2044 }
 0xf38   :  { %v1134_v59 = vadd.f32 1.0, %v2045_v36 }
 0xf3a   :  { %2046 = vrcp.f32 %v1134_v59  ;;  %v1146_v56 = vand.u32 2147483648, %v1134_v59  ;;  %vm1140_vm12 = vweird.f32 %v1134_v59  ;;  %v1144_v57 = vand.u32 2147483647, %v1134_v59 }
 0xf3b   :  { %2048 = vpow2.f32 %v1920_v10 }
 0xf3c   :  { %v1147_v60 = vor.u32 1.1754944e-38, %v1146_v56  ;;  %vm1145_vm14 = vcmp.eq.f32.partialorder %v1144_v57, 8.507059e+37 }
 0xf40   :  { %v2047_v4 = vpop.eup %2046 }
 0xf41   :  { %v1136_v49 = vmul.f32 %v2047_v4, %v1134_v59  ;;  %v2049_v51 = vpop.eup %2048  ;;  %vm1141_vm11 = vweird.f32 %v2047_v4 }
 0xf42   :  { %v1174_v54 = vadd.f32 1.0, %v2049_v51  ;;  %vm1142_vm13 = vmor %vm1140_vm12, %vm1141_vm11 }
 0xf43   :  { %v1137_v50 = vsub.f32 1.0, %v1136_v49 }
 0xf44   :  { %2050 = vrcp.f32 %v1174_v54  ;;  %v1186_v55 = vand.u32 2147483648, %v1174_v54  ;;  %vm1180_vm1 = vweird.f32 %v1174_v54  ;;  %v1184_v17 = vand.u32 2147483647, %v1174_v54 }
 0xf45   :  { %v1138_v53 = vmul.f32 %v2047_v4, %v1137_v50 }
 0xf46   :  { %v1187_v19 = vor.u32 1.1754944e-38, %v1186_v55  ;;  %vm1185_vm3 = vcmp.eq.f32.partialorder %v1184_v17, 8.507059e+37 }
 0xf47   :  { %v1139_v7 = vadd.f32 %v2047_v4, %v1138_v53 }
 0xf49   :  { %v1143_v58 = vsel %vm1142_vm13, %v2047_v4, %v1139_v7 }
 0xf4a   :  { %v1148_v63 = vsel %vm1145_vm14, %v1147_v60, %v1143_v58  ;;  %v2051_v3 = vpop.eup %2050 }
 0xf4b   :  { %v1176_v52 = vmul.f32 %v2051_v3, %v1174_v54  ;;  %vm1181_vm15 = vweird.f32 %v2051_v3  ;;  %v1154_v47 = vmul.f32 %v1152_v25, %v1148_v63 }
 0xf4c   :  { %vm1182_vm2 = vmor %vm1180_vm1, %vm1181_vm15 }
 0xf4d   :  { %v1177_v11 = vsub.f32 1.0, %v1176_v52 }
 0xf4f   :  { %v1178_v12 = vmul.f32 %v2051_v3, %v1177_v11 }
 0xf51   :  { %v1179_v14 = vadd.f32 %v2051_v3, %v1178_v12 }
 0xf53   :  { %v1183_v18 = vsel %vm1182_vm2, %v2051_v3, %v1179_v14 }
 0xf54   :  { %v1188_v21 = vsel %vm1185_vm3, %v1187_v19, %v1183_v18 }
 0xf55   :  { %v1194_v27 = vmul.f32 %v1192_v24, %v1188_v21 }
 0xf92   :  { %v1157_v61 = vpop.permute.xlu1 %1156 }
 0xf93   :  { %v1159_v8 = vmul.f32 %v1157_v61, %v1148_v63 }
 0xf95   :  { %1161 = vrot.lane.b32.xlu0 %v1159_v8, %s2128_s28 }
 0xfa9   :  { %v1197_v20 = vpop.permute.xlu0 %1196 }
 0xfaa   :  { %v1199_v23 = vmul.f32 %v1197_v20, %v1188_v21 }
 0xfac   :  { %1201 = vrot.lane.b32.xlu2 %v1199_v23, %s2128_s28 }
0x1006   :  { %v1202_v32 = vpop.permute.xlu2 %1201 }
0x1007   :  { %v2693_v37 = vadd.f32 %v1202_v32, %v1194_v27  ;;  %v1162_v38 = vpop.permute.xlu0 %1161 }
0x1008   :  { %v2695_v39 = vadd.f32 %v1162_v38, %v1154_v47 }
0x1009   :  { %2052 = vtanh.f32 %v2693_v37  ;;  %v1335_v38 = vrot.slane %v2693_v37, 2 }
0x100a   :  { %2054 = vtanh.f32 %v2695_v39  ;;  %v1295_v24 = vrot.slane %v2695_v39, 6 }
0x100f   :  { %v2053_v13 = vpop.eup %2052 }
0x1010   :  { %v2055_v41 = vpop.eup %2054  ;;  %1207 = vrot.lane.b32.xlu1 %v2053_v13, %s2126_s0 }
0x1011   :  { %1167 = vrot.lane.b32.xlu2 %v2055_v41, %s2126_s0 }
0x106b   :  { %v1168_v29 = vpop.permute.xlu2 %1167 }
0x106c   :  { %v1170_v22 = vmul.f32 %v1168_v29, %v1148_v63 }
0x106e   :  { %v1212_v42 = vrot.slane %v1170_v22, 6 }
0x1070   :  { %v2702_v43 = vadd.f32 %v1212_v42, %v2665_v40  ;;  %1219 = vrot.lane.b32.xlu1 %v1212_v42, %s2128_s28 }
0x1082   :  { %v1208_v44 = vpop.permute.xlu1 %1207 }
0x1083   :  { %v1210_v45 = vmul.f32 %v1208_v44, %v1188_v21 }
0x1085   :  { %v1216_v48 = vrot.slane %v1210_v45, 2  ;;  %1245 = vrot.lane.b32.xlu0 %v1210_v45, %s2128_s28 }
0x1087   :  { %v2707_v2 = vadd.f32 %v1216_v48, %v2670_v46 }
0x10e2   :  { %v1220_v62 = vpop.permute.xlu1 %1219 }
0x10e3   :  { %1921 = vmatmul.msk.f32.vlgmr.msrb.gmra.mxu0 %vm86_vm0, %v1220_v62 }
0x10f7   :  { %v1246_v15 = vpop.permute.xlu0 %1245 }
0x10f8   :  { %1922 = vmatmul.msk.f32.vlgmr.msra.gmra.mxu1 %vm86_vm0, %v1246_v15 }
0x1160   :  { %v1240_v26 = vpop.f32.mrf.mxu0 }
0x1161   :  { %v1243_v40 = vadd.f32 %v1240_v26, %v2604_v9 }
0x1163   :  { %v1244_v28 = vadd.f32 %v2566_v6, %v1243_v40 }
0x1165   :  { %2056 = vtanh.f32 %v1244_v28  ;;  %v1923_v36 = vmul.f32 -1.442695, %v1244_v28 }
0x116b   :  { %v2057_v30 = vpop.eup %2056 }
0x116c   :  { %1299 = vrot.lane.b32.xlu0 %v2057_v30, %s2126_s0 }
0x1175   :  { %v1266_v33 = vpop.f32.mrf.mxu1 }
0x1176   :  { %v1270_v16 = vrot.slane %v1266_v33, 2 }
0x1178   :  { %v1272_v46 = vadd.f32 %v1270_v16, %v2552_v0 }
0x117a   :  { %v1273_v31 = vadd.f32 %v2561_v5, %v1272_v46 }
0x117c   :  { %2058 = vtanh.f32 %v1273_v31  ;;  %v1924_v35 = vmul.f32 -1.442695, %v1273_v31 }
0x117e   :  { %2060 = vpow2.f32 %v1924_v35 }
0x117f   :  { %2062 = vpow2.f32 %v1923_v36 }
0x1182   :  { %v2059_v34 = vpop.eup %2058 }
0x1183   :  { %1339 = vrot.lane.b32.xlu2 %v2059_v34, %s2126_s0 }
0x1184   :  { %v2061_v59 = vpop.eup %2060 }
0x1185   :  { %v2063_v4 = vpop.eup %2062  ;;  %v1317_v10 = vadd.f32 1.0, %v2061_v59 }
0x1186   :  { %v1277_v49 = vadd.f32 1.0, %v2063_v4 }
0x1187   :  { %2064 = vrcp.f32 %v1317_v10  ;;  %v1329_v63 = vand.u32 2147483648, %v1317_v10  ;;  %vm1323_vm6 = vweird.f32 %v1317_v10  ;;  %v1327_v8 = vand.u32 2147483647, %v1317_v10 }
0x1188   :  { %2066 = vrcp.f32 %v1277_v49  ;;  %v1289_v3 = vand.u32 2147483648, %v1277_v49  ;;  %vm1283_vm7 = vweird.f32 %v1277_v49  ;;  %v1287_v52 = vand.u32 2147483647, %v1277_v49 }
0x1189   :  { %v1330_v14 = vor.u32 1.1754944e-38, %v1329_v63  ;;  %vm1328_vm11 = vcmp.eq.f32.partialorder %v1327_v8, 8.507059e+37 }
0x118a   :  { %v1290_v55 = vor.u32 1.1754944e-38, %v1289_v3  ;;  %vm1288_vm12 = vcmp.eq.f32.partialorder %v1287_v52, 8.507059e+37 }
0x118d   :  { %v2065_v50 = vpop.eup %2064 }
0x118e   :  { %v2067_v51 = vpop.eup %2066  ;;  %v1319_v53 = vmul.f32 %v2065_v50, %v1317_v10  ;;  %vm1324_vm4 = vweird.f32 %v2065_v50 }
0x118f   :  { %v1279_v54 = vmul.f32 %v2067_v51, %v1277_v49  ;;  %vm1284_vm5 = vweird.f32 %v2067_v51  ;;  %vm1325_vm9 = vmor %vm1323_vm6, %vm1324_vm4 }
0x1190   :  { %v1320_v7 = vsub.f32 1.0, %v1319_v53  ;;  %vm1285_vm10 = vmor %vm1283_vm7, %vm1284_vm5 }
0x1191   :  { %v1280_v56 = vsub.f32 1.0, %v1279_v54 }
0x1192   :  { %v1321_v57 = vmul.f32 %v2065_v50, %v1320_v7 }
0x1193   :  { %v1281_v58 = vmul.f32 %v2067_v51, %v1280_v56 }
0x1194   :  { %v1322_v60 = vadd.f32 %v2065_v50, %v1321_v57 }
0x1195   :  { %v1282_v61 = vadd.f32 %v2067_v51, %v1281_v58 }
0x1196   :  { %v1326_v11 = vsel %vm1325_vm9, %v2065_v50, %v1322_v60 }
0x1197   :  { %v1286_v12 = vsel %vm1285_vm10, %v2067_v51, %v1282_v61  ;;  %v1331_v17 = vsel %vm1328_vm11, %v1330_v14, %v1326_v11 }
0x1198   :  { %v1291_v20 = vsel %vm1288_vm12, %v1290_v55, %v1286_v12  ;;  %v1337_v13 = vmul.f32 %v1335_v38, %v1331_v17 }
0x1199   :  { %v1297_v25 = vmul.f32 %v1295_v24, %v1291_v20 }
0x11dd   :  { %v1340_v18 = vpop.permute.xlu2 %1339 }
0x11de   :  { %v1300_v19 = vpop.permute.xlu0 %1299  ;;  %v1342_v21 = vmul.f32 %v1340_v18, %v1331_v17 }
0x11df   :  { %v1302_v23 = vmul.f32 %v1300_v19, %v1291_v20 }
0x11e0   :  { %1344 = vrot.lane.b32.xlu1 %v1342_v21, %s2128_s28 }
0x11e1   :  { %1304 = vrot.lane.b32.xlu2 %v1302_v23, %s2128_s28 }
0x123b   :  { %v1305_v27 = vpop.permute.xlu2 %1304 }
0x123c   :  { %v2720_v32 = vadd.f32 %v1305_v27, %v1297_v25 }
0x123e   :  { %2068 = vtanh.f32 %v2720_v32  ;;  %v1438_v21 = vrot.slane %v2720_v32, 6 }
0x1244   :  { %v2069_v47 = vpop.eup %2068 }
0x1245   :  { %1310 = vrot.lane.b32.xlu1 %v2069_v47, %s2126_s0 }
0x1252   :  { %v1345_v41 = vpop.permute.xlu1 %1344 }
0x1253   :  { %v2725_v29 = vadd.f32 %v1345_v41, %v1337_v13 }
0x1255   :  { %2070 = vtanh.f32 %v2725_v29  ;;  %v1478_v47 = vrot.slane %v2725_v29, 2 }
0x125b   :  { %v2071_v22 = vpop.eup %2070 }
0x125c   :  { %1350 = vrot.lane.b32.xlu0 %v2071_v22, %s2126_s0 }
0x12b7   :  { %v1311_v39 = vpop.permute.xlu1 %1310 }
0x12b8   :  { %v1313_v42 = vmul.f32 %v1311_v39, %v1291_v20 }
0x12ba   :  { %v2730_v44 = vadd.f32 %v1313_v42, %v2702_v43  ;;  %1357 = vrot.lane.b32.xlu2 %v1313_v42, %s2128_s28 }
0x12ce   :  { %v1351_v45 = vpop.permute.xlu0 %1350 }
0x12cf   :  { %v1353_v48 = vmul.f32 %v1351_v45, %v1331_v17 }
0x12d1   :  { %v2734_v37 = vadd.f32 %v1353_v48, %v2707_v2  ;;  %v1387_v62 = vrot.slane %v1353_v48, 6 }
0x12d3   :  { %1388 = vrot.lane.b32.xlu0 %v1387_v62, %s2128_s28 }
0x1314   :  { %v1358_v15 = vpop.permute.xlu2 %1357 }
0x1315   :  { %1925 = vmatmul.msk.f32.vlgmr.msrb.gmra.mxu3 %vm86_vm0, %v1358_v15 }
0x1345   :  { %v1389_v26 = vpop.permute.xlu0 %1388 }
0x1346   :  { %1926 = vmatmul.msk.f32.vlgmr.msra.gmra.mxu2 %vm86_vm0, %v1389_v26 }
0x1398   :  { %v1378_v40 = vpop.f32.mrf.mxu3 }
0x1399   :  { %v1382_v28 = vrot.slane %v1378_v40, 6 }
0x139b   :  { %v1384_v43 = vadd.f32 %v1382_v28, %v2604_v9 }
0x139d   :  { %v1385_v30 = vadd.f32 %v2566_v6, %v1384_v43 }
0x139f   :  { %2072 = vtanh.f32 %v1385_v30  ;;  %v1927_v35 = vmul.f32 -1.442695, %v1385_v30 }
0x13a5   :  { %v2073_v33 = vpop.eup %2072 }
0x13a6   :  { %1442 = vrot.lane.b32.xlu1 %v2073_v33, %s2126_s0  ;;  %v2771_v33 = vld [vmem:[%s2899_s21] ss:$0 sm:$0xff] }
0x13c9   :  { %v1409_v2 = vpop.f32.mrf.mxu2 }
0x13ca   :  { %v1413_v16 = vrot.slane %v1409_v2, 4 }
0x13cc   :  { %v1415_v46 = vadd.f32 %v1413_v16, %v2552_v0 }
0x13ce   :  { %v1416_v31 = vadd.f32 %v2561_v5, %v1415_v46 }
0x13d0   :  { %2074 = vtanh.f32 %v1416_v31  ;;  %v1928_v4 = vmul.f32 -1.442695, %v1416_v31 }
0x13d1   :  { %2076 = vpow2.f32 %v1927_v35 }
0x13d6   :  { %v2075_v34 = vpop.eup %2074 }
0x13d7   :  { %1482 = vrot.lane.b32.xlu2 %v2075_v34, %s2126_s0  ;;  %v2077_v36 = vpop.eup %2076  ;;  %v2779_v34 = vld [vmem:[%s2898_s22] ss:$0 sm:$0xff] }
0x13d8   :  { %v1420_v59 = vadd.f32 1.0, %v2077_v36 }
0x13da   :  { %2078 = vrcp.f32 %v1420_v59  ;;  %v1432_v5 = vand.u32 2147483648, %v1420_v59  ;;  %vm1426_vm14 = vweird.f32 %v1420_v59  ;;  %v1430_v7 = vand.u32 2147483647, %v1420_v59 }
0x13db   :  { %2080 = vpow2.f32 %v1928_v4 }
0x13dc   :  { %v1433_v57 = vor.u32 1.1754944e-38, %v1432_v5  ;;  %vm1431_vm1 = vcmp.eq.f32.partialorder %v1430_v7, 8.507059e+37 }
0x13e0   :  { %v2079_v6 = vpop.eup %2078 }
0x13e1   :  { %v1422_v10 = vmul.f32 %v2079_v6, %v1420_v59  ;;  %v2081_v51 = vpop.eup %2080  ;;  %vm1427_vm13 = vweird.f32 %v2079_v6 }
0x13e2   :  { %v1460_v53 = vadd.f32 1.0, %v2081_v51  ;;  %vm1428_vm15 = vmor %vm1426_vm14, %vm1427_vm13 }
0x13e3   :  { %v1423_v49 = vsub.f32 1.0, %v1422_v10 }
0x13e4   :  { %2082 = vrcp.f32 %v1460_v53  ;;  %v1472_v12 = vand.u32 2147483648, %v1460_v53  ;;  %vm1466_vm3 = vweird.f32 %v1460_v53  ;;  %v1470_v14 = vand.u32 2147483647, %v1460_v53 }
0x13e5   :  { %v1424_v50 = vmul.f32 %v2079_v6, %v1423_v49 }
0x13e6   :  { %v1473_v17 = vor.u32 1.1754944e-38, %v1472_v12  ;;  %vm1471_vm5 = vcmp.eq.f32.partialorder %v1470_v14, 8.507059e+37 }
0x13e7   :  { %v1425_v54 = vadd.f32 %v2079_v6, %v1424_v50 }
0x13e9   :  { %v1429_v56 = vsel %vm1428_vm15, %v2079_v6, %v1425_v54 }
0x13ea   :  { %v1434_v60 = vsel %vm1431_vm1, %v1433_v57, %v1429_v56  ;;  %v2083_v63 = vpop.eup %2082 }
0x13eb   :  { %v1462_v3 = vmul.f32 %v2083_v63, %v1460_v53  ;;  %vm1467_vm2 = vweird.f32 %v2083_v63  ;;  %v1440_v23 = vmul.f32 %v1438_v21, %v1434_v60 }
0x13ec   :  { %vm1468_vm4 = vmor %vm1466_vm3, %vm1467_vm2 }
0x13ed   :  { %v1463_v8 = vsub.f32 1.0, %v1462_v3 }
0x13ef   :  { %v1464_v52 = vmul.f32 %v2083_v63, %v1463_v8 }
0x13f1   :  { %v1465_v11 = vadd.f32 %v2083_v63, %v1464_v52 }
0x13f3   :  { %v1469_v55 = vsel %vm1468_vm4, %v2083_v63, %v1465_v11 }
0x13f4   :  { %v1474_v18 = vsel %vm1471_vm5, %v1473_v17, %v1469_v55 }
0x13f5   :  { %v1480_v38 = vmul.f32 %v1478_v47, %v1474_v18 }
0x1418   :  { %v1443_v58 = vpop.permute.xlu1 %1442 }
0x1419   :  { %v1445_v61 = vmul.f32 %v1443_v58, %v1434_v60 }
0x141b   :  { %1447 = vrot.lane.b32.xlu0 %v1445_v61, %s2128_s28 }
0x1431   :  { %v1483_v19 = vpop.permute.xlu2 %1482 }
0x1432   :  { %v1485_v20 = vmul.f32 %v1483_v19, %v1474_v18 }
0x1434   :  { %1487 = vrot.lane.b32.xlu1 %v1485_v20, %s2128_s28 }
0x148d   :  { %v1448_v24 = vpop.permute.xlu0 %1447 }
0x148e   :  { %v2748_v25 = vadd.f32 %v1448_v24, %v1440_v23 }
0x1490   :  { %2084 = vtanh.f32 %v2748_v25  ;;  %v1585_v24 = vrot.slane %v2748_v25, 6 }
0x1496   :  { %v2085_v27 = vpop.eup %2084 }
0x1497   :  { %1453 = vrot.lane.b32.xlu2 %v2085_v27, %s2126_s0 }
0x14a6   :  { %v1488_v13 = vpop.permute.xlu1 %1487 }
0x14a7   :  { %v2753_v41 = vadd.f32 %v1488_v13, %v1480_v38 }
0x14a9   :  { %2086 = vtanh.f32 %v2753_v41 }
0x14af   :  { %v2087_v22 = vpop.eup %2086 }
0x14b0   :  { %1493 = vrot.lane.b32.xlu0 %v2087_v22, %s2126_s0  ;;  %v1625_v22 = vrot.slane %v2753_v41, 2 }
0x14f1   :  { %v1454_v32 = vpop.permute.xlu2 %1453 }
0x14f2   :  { %v1456_v39 = vmul.f32 %v1454_v32, %v1434_v60 }
0x14f4   :  { %v1498_v42 = vrot.slane %v1456_v39, 2 }
0x14f6   :  { %v2758_v45 = vadd.f32 %v1498_v42, %v2730_v44  ;;  %1505 = vrot.lane.b32.xlu1 %v1498_v42, %s2128_s28 }
0x1522   :  { %v1494_v48 = vpop.permute.xlu0 %1493 }
0x1523   :  { %v1496_v62 = vmul.f32 %v1494_v48, %v1474_v18 }
0x1525   :  { %v1502_v29 = vrot.slane %v1496_v62, 6  ;;  %v1534_v15 = vrot.slane %v1496_v62, 4 }
0x1527   :  { %v2762_v26 = vadd.f32 %v1502_v29, %v2734_v37  ;;  %1535 = vrot.lane.b32.xlu2 %v1534_v15, %s2128_s28 }
0x1568   :  { %v1506_v40 = vpop.permute.xlu1 %1505 }
0x1569   :  { %1929 = vmatmul.msk.f32.vlgmr.msra.gmra.mxu0 %vm86_vm0, %v1506_v40 }
0x1581   :  { %v1536_v28 = vpop.permute.xlu2 %1535 }
0x1582   :  { %1930 = vmatmul.msk.f32.vlgmr.msrb.gmra.mxu1 %vm86_vm0, %v1536_v28 }
0x15e6   :  { %v1526_v43 = vpop.f32.mrf.mxu0 }
0x15e7   :  { %v1530_v44 = vrot.slane %v1526_v43, 4 }
0x15e9   :  { %v1532_v30 = vadd.f32 %v1530_v44, %v2604_v9 }
0x15eb   :  { %v1533_v37 = vadd.f32 %v2771_v33, %v1532_v30 }
0x15ed   :  { %2088 = vtanh.f32 %v1533_v37  ;;  %v1931_v59 = vmul.f32 -1.442695, %v1533_v37 }
0x15f3   :  { %v2089_v2 = vpop.eup %2088 }
0x15f4   :  { %1589 = vrot.lane.b32.xlu0 %v2089_v2, %s2126_s0 }
0x15ff   :  { %v1556_v16 = vpop.f32.mrf.mxu1 }
0x1600   :  { %v1560_v46 = vrot.slane %v1556_v16, 6 }
0x1602   :  { %v1562_v31 = vadd.f32 %v1560_v46, %v2552_v0 }
0x1604   :  { %v1563_v35 = vadd.f32 %v2779_v34, %v1562_v31 }
0x1606   :  { %2090 = vtanh.f32 %v1563_v35  ;;  %v1932_v49 = vmul.f32 -1.442695, %v1563_v35 }
0x1607   :  { %2092 = vpow2.f32 %v1931_v59 }
0x160c   :  { %v2091_v36 = vpop.eup %2090 }
0x160d   :  { %1629 = vrot.lane.b32.xlu1 %v2091_v36, %s2126_s0  ;;  %v2093_v6 = vpop.eup %2092 }
0x160e   :  { %v1567_v4 = vadd.f32 1.0, %v2093_v6 }
0x1610   :  { %2094 = vrcp.f32 %v1567_v4  ;;  %v1579_v56 = vand.u32 2147483648, %v1567_v4  ;;  %vm1573_vm7 = vweird.f32 %v1567_v4  ;;  %v1577_v57 = vand.u32 2147483647, %v1567_v4 }
0x1611   :  { %2096 = vpow2.f32 %v1932_v49 }
0x1612   :  { %v1580_v60 = vor.u32 1.1754944e-38, %v1579_v56  ;;  %vm1578_vm10 = vcmp.eq.f32.partialorder %v1577_v57, 8.507059e+37 }
0x1616   :  { %v2095_v10 = vpop.eup %2094 }
0x1617   :  { %v1569_v50 = vmul.f32 %v2095_v10, %v1567_v4  ;;  %v2097_v54 = vpop.eup %2096  ;;  %vm1574_vm6 = vweird.f32 %v2095_v10 }
0x1618   :  { %v1607_v5 = vadd.f32 1.0, %v2097_v54  ;;  %vm1575_vm9 = vmor %vm1573_vm7, %vm1574_vm6 }
0x1619   :  { %v1570_v51 = vsub.f32 1.0, %v1569_v50 }
0x161a   :  { %2098 = vrcp.f32 %v1607_v5  ;;  %v1619_v55 = vand.u32 2147483648, %v1607_v5  ;;  %vm1613_vm12 = vweird.f32 %v1607_v5  ;;  %v1617_v17 = vand.u32 2147483647, %v1607_v5 }
0x161b   :  { %v1571_v53 = vmul.f32 %v2095_v10, %v1570_v51 }
0x161c   :  { %v1620_v19 = vor.u32 1.1754944e-38, %v1619_v55  ;;  %vm1618_vm14 = vcmp.eq.f32.partialorder %v1617_v17, 8.507059e+37 }
0x161d   :  { %v1572_v7 = vadd.f32 %v2095_v10, %v1571_v53 }
0x161f   :  { %v1576_v58 = vsel %vm1575_vm9, %v2095_v10, %v1572_v7  ;;  %vm1828_vm9 = vcmask 1040384  }
0x1620   :  { %v1581_v63 = vsel %vm1578_vm10, %v1580_v60, %v1576_v58  ;;  %v2099_v8 = vpop.eup %2098  ;;  %vm1852_vm10 = vcmask 785408  }
0x1621   :  { %v1609_v52 = vmul.f32 %v2099_v8, %v1607_v5  ;;  %vm1614_vm11 = vweird.f32 %v2099_v8  ;;  %v1587_v27 = vmul.f32 %v1585_v24, %v1581_v63 }
0x1622   :  { %vm1615_vm13 = vmor %vm1613_vm12, %vm1614_vm11  ;;  %vm1881_vm11 = vcmask 826368  }
0x1623   :  { %v1610_v11 = vsub.f32 1.0, %v1609_v52 }
0x1625   :  { %v1611_v12 = vmul.f32 %v2099_v8, %v1610_v11 }
0x1627   :  { %v1612_v14 = vadd.f32 %v2099_v8, %v1611_v12 }
0x1629   :  { %v1616_v18 = vsel %vm1615_vm13, %v2099_v8, %v1612_v14 }
0x162a   :  { %v1621_v21 = vsel %vm1618_vm14, %v1620_v19, %v1616_v18 }
0x162b   :  { %v1627_v32 = vmul.f32 %v1625_v22, %v1621_v21 }
0x1666   :  { %v1590_v61 = vpop.permute.xlu0 %1589 }
0x1667   :  { %v1592_v3 = vmul.f32 %v1590_v61, %v1581_v63 }
0x1669   :  { %1594 = vrot.lane.b32.xlu2 %v1592_v3, %s2128_s28 }
0x167f   :  { %v1630_v20 = vpop.permute.xlu1 %1629 }
0x1680   :  { %v1632_v23 = vmul.f32 %v1630_v20, %v1621_v21 }
0x1682   :  { %1634 = vrot.lane.b32.xlu0 %v1632_v23, %s2128_s28 }
0x16c3   :  { %v1595_v47 = vpop.permute.xlu2 %1594 }
0x16c4   :  { %v2786_v38 = vadd.f32 %v1595_v47, %v1587_v27 }
0x16c6   :  { %2100 = vtanh.f32 %v2786_v38  ;;  %v1729_v20 = vrot.slane %v2786_v38, 6 }
0x16cc   :  { %v2101_v13 = vpop.eup %2100 }
0x16cd   :  { %1600 = vrot.lane.b32.xlu1 %v2101_v13, %s2126_s0 }
0x16f4   :  { %v1635_v39 = vpop.permute.xlu0 %1634 }
0x16f5   :  { %v2791_v42 = vadd.f32 %v1635_v39, %v1627_v32 }
0x16f7   :  { %2102 = vtanh.f32 %v2791_v42  ;;  %v1769_v47 = vrot.slane %v2791_v42, 2  ;;  %v1966_v42 = vld [vmem:[%s2897_s17] ss:$0 sm:$0xff] }
0x16fd   :  { %v2103_v48 = vpop.eup %2102 }
0x16fe   :  { %1640 = vrot.lane.b32.xlu2 %v2103_v48, %s2126_s0 }
0x173f   :  { %v1601_v25 = vpop.permute.xlu1 %1600 }
0x1740   :  { %v1603_v62 = vmul.f32 %v1601_v25, %v1581_v63 }
0x1742   :  { %v1645_v29 = vrot.slane %v1603_v62, 4 }
0x1744   :  { %v2796_v15 = vadd.f32 %v1645_v29, %v2758_v45  ;;  %1652 = vrot.lane.b32.xlu0 %v1645_v29, %s2128_s28 }
0x1758   :  { %v1641_v40 = vpop.permute.xlu2 %1640 }
0x1759   :  { %v1643_v28 = vmul.f32 %v1641_v40, %v1621_v21 }
0x175b   :  { %v1649_v41 = vrot.slane %v1643_v28, 4  ;;  %v1681_v43 = vrot.slane %v1643_v28, 2 }
0x175d   :  { %v2800_v44 = vadd.f32 %v1649_v41, %v2762_v26  ;;  %1682 = vrot.lane.b32.xlu1 %v1681_v43, %s2128_s28  ;;  %v577_v41 = vadd.f32 %v1966_v42, %v2554_v1  ;;  %v1846_v1 = vld [vmem:[%s2901_s23 + $0x50] sm:$0xff] }
0x17b6   :  { %v1653_v30 = vpop.permute.xlu0 %1652 }
0x17b7   :  { %1933 = vmatmul.msk.f32.vlgmr.msra.gmra.mxu3 %vm86_vm0, %v1653_v30 }
0x17cf   :  { %v1683_v37 = vpop.permute.xlu1 %1682 }
0x17d0   :  { %1934 = vmatmul.msk.f32.vlgmr.msrb.gmra.mxu2 %vm86_vm0, %v1683_v37 }
0x183a   :  { %v1673_v2 = vpop.f32.mrf.mxu3 }
0x183b   :  { %v1677_v45 = vrot.slane %v1673_v2, 2 }
0x183d   :  { %v1679_v16 = vadd.f32 %v1677_v45, %v2604_v9  ;;  %v1847_v45 = vld [vmem:[%s2901_s23 + $0x58] sm:$0xff] }
0x183e   :  { %1860 = vmatpush.msrb.mxu0 %v1847_v45 }
0x183f   :  { %v1680_v46 = vadd.f32 %v2771_v33, %v1679_v16  ;;  %v1844_v16 = vld [vmem:[%s2901_s23 + $0x40] sm:$0xff] }
0x1840   :  { %1861 = vmatpush.msrb.mxu0 %v1846_v1 }
0x1841   :  { %2104 = vtanh.f32 %v1680_v46  ;;  %v1935_v4 = vmul.f32 -1.442695, %v1680_v46  ;;  %v1843_v46 = vld [vmem:[%s2901_s23 + $0x38] sm:$0xff] }
0x1847   :  { %v2105_v31 = vpop.eup %2104 }
0x1848   :  { %1733 = vrot.lane.b32.xlu0 %v2105_v31, %s2126_s0  ;;  %v1842_v31 = vld [vmem:[%s2901_s23 + $0x30] sm:$0xff] }
0x1853   :  { %v1703_v26 = vpop.f32.mrf.mxu2 }
0x1854   :  { %v1706_v35 = vadd.f32 %v1703_v26, %v2552_v0  ;;  %v1841_v26 = vld [vmem:[%s2901_s23 + $0x28] sm:$0xff] }
0x1856   :  { %v1707_v36 = vadd.f32 %v2779_v34, %v1706_v35  ;;  %v1840_v35 = vld [vmem:[%s2901_s23 + $0x20] sm:$0xff] }
0x1858   :  { %2106 = vtanh.f32 %v1707_v36  ;;  %v1936_v6 = vmul.f32 -1.442695, %v1707_v36  ;;  %v1839_v36 = vld [vmem:[%s2901_s23 + $0x18] sm:$0xff] }
0x185a   :  { %2108 = vpow2.f32 %v1936_v6  ;;  %v1837_v6 = vld [vmem:[%s2901_s23 + $0x8] sm:$0xff] }
0x185b   :  { %2110 = vpow2.f32 %v1935_v4  ;;  %v1836_v4 = vld [vmem:[%s2901_s23] sm:$0xff] }
0x185e   :  { %v2107_v59 = vpop.eup %2106 }
0x185f   :  { %1773 = vrot.lane.b32.xlu2 %v2107_v59, %s2126_s0  ;;  %v1838_v59 = vld [vmem:[%s2901_s23 + $0x10] sm:$0xff] }
0x1860   :  { %v2109_v9 = vpop.eup %2108 }
0x1861   :  { %v2111_v10 = vpop.eup %2110  ;;  %v1751_v33 = vadd.f32 1.0, %v2109_v9 }
0x1862   :  { %v1711_v49 = vadd.f32 1.0, %v2111_v10 }
0x1863   :  { %2112 = vrcp.f32 %v1751_v33  ;;  %v1763_v58 = vand.u32 2147483648, %v1751_v33  ;;  %vm1757_vm2 = vweird.f32 %v1751_v33  ;;  %v1761_v61 = vand.u32 2147483647, %v1751_v33 }
0x1864   :  { %2114 = vrcp.f32 %v1711_v49  ;;  %v1723_v60 = vand.u32 2147483648, %v1711_v49  ;;  %vm1717_vm3 = vweird.f32 %v1711_v49  ;;  %v1721_v63 = vand.u32 2147483647, %v1711_v49 }
0x1865   :  { %v1764_v52 = vor.u32 1.1754944e-38, %v1763_v58  ;;  %vm1762_vm6 = vcmp.eq.f32.partialorder %v1761_v61, 8.507059e+37 }
0x1866   :  { %v1724_v11 = vor.u32 1.1754944e-38, %v1723_v60  ;;  %vm1722_vm7 = vcmp.eq.f32.partialorder %v1721_v63, 8.507059e+37  ;;  %v1969_v60 = vld [vmem:[%s2900_s24] ss:$0 sm:$0xff] }
0x1869   :  { %v2113_v50 = vpop.eup %2112 }
0x186a   :  { %v2115_v51 = vpop.eup %2114  ;;  %v1753_v53 = vmul.f32 %v2113_v50, %v1751_v33  ;;  %vm1758_vm15 = vweird.f32 %v2113_v50 }
0x186b   :  { %v1713_v0 = vmul.f32 %v2115_v51, %v1711_v49  ;;  %vm1718_vm1 = vweird.f32 %v2115_v51  ;;  %vm1759_vm4 = vmor %vm1757_vm2, %vm1758_vm15 }
0x186c   :  { %v1754_v54 = vsub.f32 1.0, %v1753_v53  ;;  %vm1719_vm5 = vmor %vm1717_vm3, %vm1718_vm1 }
0x186d   :  { %v1714_v34 = vsub.f32 1.0, %v1713_v0 }
0x186e   :  { %v1755_v5 = vmul.f32 %v2113_v50, %v1754_v54 }
0x186f   :  { %v1715_v7 = vmul.f32 %v2115_v51, %v1714_v34 }
0x1870   :  { %v1756_v56 = vadd.f32 %v2113_v50, %v1755_v5 }
0x1871   :  { %v1716_v57 = vadd.f32 %v2115_v51, %v1715_v7 }
0x1872   :  { %v1760_v3 = vsel %vm1759_vm4, %v2113_v50, %v1756_v56 }
0x1873   :  { %v1720_v8 = vsel %vm1719_vm5, %v2115_v51, %v1716_v57  ;;  %v1765_v14 = vsel %vm1762_vm6, %v1764_v52, %v1760_v3 }
0x1874   :  { %v1725_v17 = vsel %vm1722_vm7, %v1724_v11, %v1720_v8  ;;  %v1771_v13 = vmul.f32 %v1769_v47, %v1765_v14 }
0x1875   :  { %v1731_v21 = vmul.f32 %v1729_v20, %v1725_v17 }
0x18b9   :  { %v1774_v12 = vpop.permute.xlu2 %1773 }
0x18ba   :  { %v1734_v55 = vpop.permute.xlu0 %1733  ;;  %v1776_v18 = vmul.f32 %v1774_v12, %v1765_v14 }
0x18bb   :  { %v1736_v19 = vmul.f32 %v1734_v55, %v1725_v17 }
0x18bc   :  { %1778 = vrot.lane.b32.xlu1 %v1776_v18, %s2128_s28 }
0x18bd   :  { %1738 = vrot.lane.b32.xlu2 %v1736_v19, %s2128_s28 }
0x1917   :  { %v1739_v23 = vpop.permute.xlu2 %1738 }
0x1918   :  { %v1741_v24 = vadd.f32 %v1739_v23, %v1731_v21 }
0x191a   :  { %2116 = vtanh.f32 %v1741_v24 }
0x1920   :  { %v2117_v27 = vpop.eup %2116 }
0x1921   :  { %1744 = vrot.lane.b32.xlu1 %v2117_v27, %s2126_s0 }
0x192e   :  { %v1779_v22 = vpop.permute.xlu1 %1778 }
0x192f   :  { %v1781_v32 = vadd.f32 %v1779_v22, %v1771_v13 }
0x1931   :  { %2118 = vtanh.f32 %v1781_v32 }
0x1932   :  { %2120 = vtanh.f32 %v577_v41 }
0x1937   :  { %v2119_v39 = vpop.eup %2118 }
0x1938   :  { %1784 = vrot.lane.b32.xlu0 %v2119_v39, %s2126_s0  ;;  %v2121_v2 = vpop.eup %2120 }
0x1993   :  { %v1745_v48 = vpop.permute.xlu1 %1744 }
0x1994   :  { %v1747_v25 = vmul.f32 %v1745_v48, %v1725_v17 }
0x1996   :  { %1806 = vrot.lane.b32.xlu2 %v1747_v25, %s2128_s28  ;;  %v1809_v38 = vrot.slane %v1747_v25, 1  ;;  %v1789_v62 = vrot.slane %v1747_v25, 6 }
0x1998   :  { %1810 = vrot.lane.b32.xlu0 %v1809_v38, %s2126_s0  ;;  %v1791_v29 = vadd.f32 %v1789_v62, %v2796_v15 }
0x19a0   :  { %1797 = vrot.lane.b32.xlu0 %v1791_v29, %s2128_s28 }
0x19aa   :  { %v1785_v40 = vpop.permute.xlu0 %1784 }
0x19ab   :  { %v1787_v28 = vmul.f32 %v1785_v40, %v1765_v14 }
0x19ad   :  { %v1793_v43 = vrot.slane %v1787_v28, 2  ;;  %1814 = vrot.lane.b32.xlu1 %v1787_v28, %s2128_s28  ;;  %v1817_v30 = vrot.slane %v1787_v28, 1 }
0x19af   :  { %1818 = vrot.lane.b32.xlu2 %v1817_v30, %s2126_s0  ;;  %v1795_v37 = vadd.f32 %v1793_v43, %v2800_v44  ;;  %v1845_v44 = vld [vmem:[%s2901_s23 + $0x48] sm:$0xff] }
0x19b0   :  { %1862 = vmatpush.msrb.mxu0 %v1845_v44 }
0x19b1   :  { %v1801_v15 = vrot.slane %v1795_v37, 6 }
0x19b2   :  { %1863 = vmatpush.msrb.mxu0 %v1844_v16 }
0x19b4   :  { %1864 = vmatpush.msrb.mxu0 %v1843_v46 }
0x19b5   :  { %1802 = vrot.lane.b32.xlu1 %v1801_v15, %s2126_s0 }
0x19b6   :  { %1865 = vmatpush.msrb.mxu0 %v1842_v31 }
0x19b7   :  { %1832 = vrot.lane.b32.xlu2 %v2121_v2, %s2126_s0 }
0x19b8   :  { %1866 = vmatpush.msrb.mxu0 %v1841_v26 }
0x19ba   :  { %1867 = vmatpush.msrb.mxu0 %v1840_v35 }
0x19bc   :  { %1868 = vmatpush.msrb.mxu0 %v1839_v36 }
0x19be   :  { %1869 = vmatpush.msrb.mxu0 %v1838_v59 }
0x19c0   :  { %1870 = vmatpush.msrb.mxu0 %v1837_v6 }
0x19c2   :  { %1871 = vmatpush.msrb.mxu0 %v1836_v4 }
0x19f0   :  { %v1807_v9 = vpop.permute.xlu2 %1806 }
0x1a09   :  { %v1819_v49 = vpop.permute.xlu2 %1818 }
0x1a0a   :  { %v1811_v10 = vpop.permute.xlu0 %1810 }
0x1a0b   :  { %v1813_v51 = vsel %vm86_vm0, %v1807_v9, %v1811_v10 }
0x1a0c   :  { %v1823_v0 = vrot.slane %v1813_v51, 6 }
0x1a11   :  { %v1833_v57 = vpop.permute.xlu2 %1832 }
0x1a12   :  { %v1798_v54 = vpop.permute.xlu0 %1797 }
0x1a1f   :  { %v1815_v33 = vpop.permute.xlu1 %1814 }
0x1a20   :  { %v1821_v50 = vsel %vm86_vm0, %v1815_v33, %v1819_v49 }
0x1a21   :  { %v1826_v53 = vrot.slane %v1821_v50, 7 }
0x1a23   :  { %v1829_v5 = vsel %vm1828_vm9, %v1823_v0, %v1826_v53 }
0x1a27   :  { %v1803_v34 = vpop.permute.xlu1 %1802 }
0x1a28   :  { %v1805_v7 = vsel %vm86_vm0, %v1798_v54, %v1803_v34 }
0x1a29   :  { %v1830_v56 = vadd.f32 %v1829_v5, %v1805_v7 }
0x1a2b   :  { %v1835_v58 = vsel %vm460_vm8, %v1830_v56, %v1833_v57 }
0x1a2c   :  { %1937 = vmatmul.msk.f32.vlgmr.msrb.gmra.mxu0 %vm1852_vm10, %v1835_v58 }
0x1aa9   :  { %v1873_v61 = vpop.f32.mrf.mxu0 }
0x1aaa   :  { %v1874_v63 = vadd.f32 %v1969_v60, %v1873_v61 }
0x1aac   :  { %1877 = vrot.lane.b32.xlu0 %v1874_v63, %s2125_s8 }
0x1b1e   :  { %v1878_v3 = vpop.permute.xlu0 %1877 }
0x1b1f   :  { %v1880_v8 = vsel %vm1852_vm10, %v1835_v58, %v1878_v3 }
0x1b20   :  { %v1882_v52 = vsel %vm1881_vm11, %v1880_v8, 0.0 }
0x1b21   :  { %1883 = vst [vmem:[%s2902_s25] sm:$0x3] %v1882_v52 }

</bundles_post_ra>
